<compile_context>
chip_gen: v6e
topology: v6e:2x2x1
jax: 0.10.0
libtpu: 0.0.40
codegen_flags: <defaults>
</compile_context>

<pallas_src>
import jax
import jax.numpy as jnp
from jax import lax
from jax.experimental import pallas as pl
from jax.experimental.pallas import tpu as pltpu


def _round_up(x, m):
    return (x + m - 1) // m * m


def _make_selfatt_kernel(c, cq_pad):
    """Kernel factory; c = channels, cq_pad = 8-aligned width of f/g branches."""
    off_g = cq_pad
    off_h = 2 * cq_pad

    def kernel(x_ref, w_ref, b_ref, o_ref):
        # x_ref: (Bb, C, N) f32    channels on sublanes, tokens on lanes
        # w_ref: (P, C)     bf16   fused, BN-folded [Wf; Wg; Wh; ones; pad]^T
        # b_ref: (P, 1)     f32    fused folded biases (ones-row bias = 1)
        # o_ref: (Bb, C, N)
        w = w_ref[...]                                   # hoisted constant load
        b = b_ref[...]
        for bb in range(x_ref.shape[0]):                 # small static unroll
            x = x_ref[bb]                                # (C, N) f32
            xb = x.astype(jnp.bfloat16)

            # Fused projection for all branches: relu(W_all @ x + b) -> (P, N).
            y = lax.dot_general(w, xb, (((1,), (0,)), ((), ())),
                                preferred_element_type=jnp.float32)
            y = jnp.maximum(y + b, 0.0)                  # f32 VPU

            # Sublane (row) slices at 8-aligned offsets.
            f_t = y[:cq_pad].astype(jnp.bfloat16)                # (cq_pad, N)
            g_t = y[off_g:off_g + cq_pad].astype(jnp.bfloat16)   # (cq_pad, N)
            h1_t = y[off_h:off_h + c + 1].astype(jnp.bfloat16)   # (C+1, N), last row == 1

            # s[i, j] = sum_k g_t[k, i] * f_t[k, j]  (== torch bmm(g^T, f)).
            s = lax.dot_general(g_t, f_t, (((0,), (0,)), ((), ())),
                                preferred_element_type=jnp.float32)   # (N, N)

            # Softmax numerator in f32; normalization deferred past the matmul.
            s_max = jnp.max(s, axis=-1, keepdims=True)
            p = jnp.exp(s - s_max)                       # (N, N) f32
            pb = p.astype(jnp.bfloat16)

            # od[r, i] = sum_j h1_t[r, j] * p[i, j];  row C is the softmax
            # denominator per query token, already oriented as a lane vector.
            od = lax.dot_general(h1_t, pb, (((1,), (1,)), ((), ())),
                                 preferred_element_type=jnp.float32)  # (C+1, N)
            denom = od[c:c + 1]                          # (1, N)
            o_t = od[:c] * pl.reciprocal(denom, approx=True)          # (C, N)

            # Gate with the input and store lane-dense (last dim = N).
            o_ref[bb] = (o_t * x).astype(o_ref.dtype)

    return kernel


def self_att_cn_pallas(x_cn, w_t, b_col, cq_pad, *, batch_block=1,
                       vmem_limit_bytes=48 * 1024 * 1024):
    """Channels-first token entry point. x_cn: (B, C, N) f32."""
    B, C, N = x_cn.shape
    P = w_t.shape[0]
    bb = batch_block if (batch_block > 0 and B % batch_block == 0) else 1

    kernel = _make_selfatt_kernel(C, cq_pad)

    cost = pl.CostEstimate(
        flops=int(2 * B * (N * C * P + N * N * cq_pad + N * N * (C + 1))),
        transcendentals=int(B * (N * N + N)),
        bytes_accessed=int(2 * B * C * N * 4 + P * C * 2 + P * 4))

    return pl.pallas_call(
        kernel,
        out_shape=jax.ShapeDtypeStruct((B, C, N), x_cn.dtype),
        grid_spec=pltpu.PrefetchScalarGridSpec(
            num_scalar_prefetch=0,
            grid=(B // bb,),
            in_specs=[
                pl.BlockSpec((bb, C, N), lambda i: (i, 0, 0)),   # activations
                pl.BlockSpec((P, C), lambda i: (0, 0)),          # fused weights
                pl.BlockSpec((P, 1), lambda i: (0, 0)),          # fused biases
            ],
            out_specs=pl.BlockSpec((bb, C, N), lambda i: (i, 0, 0)),
        ),
        compiler_params=pltpu.CompilerParams(
            dimension_semantics=("parallel",),
            # v5e/v6e can go higher for large N; keep <=48 MiB for v7x headroom.
            vmem_limit_bytes=vmem_limit_bytes),
        cost_estimate=cost,
    )(x_cn, w_t, b_col)


def self_att_pallas(x_nchw, w_t, b_col, cq_pad, *, batch_block=1):
    """NCHW wrapper matching the PyTorch module interface (no transposes)."""
    B, C, H, W = x_nchw.shape
    x_cn = x_nchw.reshape(B, C, H * W)          # free reshape, layout preserved
    out_cn = self_att_cn_pallas(x_cn, w_t, b_col, cq_pad, batch_block=batch_block)
    return out_cn.reshape(B, C, H, W)


def make_params(key, c):
    """Deterministic synthetic parameters; eval-mode BN folded to scale/bias."""
    cq = c // 4
    eps = 1e-5
    ks = jax.random.split(key, 18)

    def branch(keys, cin, cout):
        kw, kb, kg, kbe, km, kv = keys
        w_conv = jax.random.normal(kw, (cin, cout), jnp.float32) * 0.1
        b_conv = jax.random.normal(kb, (cout,), jnp.float32) * 0.05
        gamma = 1.0 + 0.1 * jax.random.normal(kg, (cout,), jnp.float32)
        beta = 0.1 * jax.random.normal(kbe, (cout,), jnp.float32)
        r_mean = 0.05 * jax.random.normal(km, (cout,), jnp.float32)
        r_var = jnp.abs(1.0 + 0.1 * jax.random.normal(kv, (cout,), jnp.float32))
        scale = gamma / jnp.sqrt(r_var + eps)          # eval-mode BN fold
        bias = (b_conv - r_mean) * scale + beta
        return w_conv, scale.reshape(1, cout), bias.reshape(1, cout)

    wf, sf, bf = branch(ks[0:6], c, cq)
    wg, sg, bg = branch(ks[6:12], c, cq)
    wh, sh, bh = branch(ks[12:18], c, c)
    return dict(wf=wf, sf=sf, bf=bf, wg=wg, sg=sg, bg=bg, wh=wh, sh=sh, bh=bh)


def fuse_params(params, mxu_dtype=jnp.bfloat16):
    """Fold BN scales into the conv weights and fuse f|g|h (+ ones row).

    Produces a transposed fused weight W_t of shape (P, C) and bias (P, 1) so
    the kernel computes relu(W_t @ x + b) with channels on sublanes.  Row
    layout (8-aligned offsets):
        [0, cq)                         f
        [cq_pad, cq_pad + cq)           g
        [2*cq_pad, 2*cq_pad + C)        h
        [2*cq_pad + C]                  ones row (weight 0, bias 1)
        remainder                       zero padding
    """
    wf = params["wf"] * params["sf"]
    wg = params["wg"] * params["sg"]
    wh = params["wh"] * params["sh"]
    bf = params["bf"][0]
    bg = params["bg"][0]
    bh = params["bh"][0]

    c = wh.shape[0]
    cq = wf.shape[1]
    cq_pad = _round_up(cq, 8)
    p_rows = _round_up(2 * cq_pad + c + 1, 8)

    w_t = jnp.zeros((p_rows, c), jnp.float32)
    w_t = w_t.at[:cq, :].set(wf.T)
    w_t = w_t.at[cq_pad:cq_pad + cq, :].set(wg.T)
    w_t = w_t.at[2 * cq_pad:2 * cq_pad + c, :].set(wh.T)

    b_col = jnp.zeros((p_rows, 1), jnp.float32)
    b_col = b_col.at[:cq, 0].set(bf)
    b_col = b_col.at[cq_pad:cq_pad + cq, 0].set(bg)
    b_col = b_col.at[2 * cq_pad:2 * cq_pad + c, 0].set(bh)
    b_col = b_col.at[2 * cq_pad + c, 0].set(1.0)   # ones row -> softmax denom

    return w_t.astype(mxu_dtype), b_col, cq_pad


def self_att_reference(x_nchw, params):
    """Pure-JAX f32 reference mirroring the torch forward (eval-mode BN)."""
    B, C, H, W = x_nchw.shape
    N = H * W
    x_tok = jnp.transpose(x_nchw, (0, 2, 3, 1)).reshape(B, N, C)

    def proj(x, w, s, b):
        return jnp.maximum(jnp.einsum("bnc,co->bno", x, w) * s + b, 0.0)

    f = proj(x_tok, params["wf"], params["sf"], params["bf"])
    g = proj(x_tok, params["wg"], params["sg"], params["bg"])
    h = proj(x_tok, params["wh"], params["sh"], params["bh"])
    s = jnp.einsum("bik,bjk->bij", g, f)
    beta = jax.nn.softmax(s, axis=-1)
    o = jnp.einsum("bij,bjc->bic", beta, h)
    out = o * x_tok
    return jnp.transpose(out.reshape(B, H, W, C), (0, 3, 1, 2))


if __name__ == "__main__":
    B, C, H, W = 2, 32, 16, 16     # N = H*W = 256 tokens, Cq = 8
    key = jax.random.PRNGKey(0)
    kx, kp = jax.random.split(key)

    x = jax.random.normal(kx, (B, C, H, W), jnp.float32)
    params = make_params(kp, C)
    w_t, b_col, cq_pad = fuse_params(params)

    # At demo sizes the kernel is per-step-overhead bound, so fold both batch
    # elements into one grid step (review suggestion for small B / small N*C).
    out = jax.block_until_ready(
        self_att_pallas(x, w_t, b_col, cq_pad, batch_block=2))
    ref = jax.block_until_ready(self_att_reference(x, params))

    # bf16 MXU inputs (f32 accumulation) + approx softmax reciprocal deviate
    # from the pure-f32 reference at the ~1% level -> loosened tolerance.
    if not jnp.allclose(out, ref, atol=5e-2, rtol=5e-2):
        raise AssertionError("Pallas SelfAtt kernel mismatch vs JAX reference")

    print("KERNEL_OK")
</pallas_src>

<mosaic_0001>
module attributes {stable_mosaic.version = 11 : i64} {
  func.func @kernel(%arg0: i32, %arg1: memref<2x32x256xf32, #tpu.memory_space<vmem>>, %arg2: memref<56x32xbf16, #tpu.memory_space<vmem>>, %arg3: memref<56x1xf32, #tpu.memory_space<vmem>>, %arg4: memref<2x32x256xf32, #tpu.memory_space<vmem>>) attributes {dimension_semantics = [#tpu.dimension_semantics<parallel>], iteration_bounds = array<i64: 1>, scalar_prefetch = 0 : i64, scratch_operands = 0 : i64, tpu.core_type = #tpu.core_type<tc>, window_params = [{transform_indices = @transform_0, window_bounds = array<i64: 2, 32, 256>}, {pipeline_mode = #tpu.pipeline_mode<synchronous>, transform_indices = @transform_1, window_bounds = array<i64: 56, 32>}, {pipeline_mode = #tpu.pipeline_mode<synchronous>, transform_indices = @transform_2, window_bounds = array<i64: 56, 1>}, {transform_indices = @transform_3, window_bounds = array<i64: 2, 32, 256>}]} {
    %c0 = arith.constant 0 : index
    %c0_0 = arith.constant 0 : index
    %0 = vector.load %arg2[%c0, %c0_0] : memref<56x32xbf16, #tpu.memory_space<vmem>>, vector<56x32xbf16>
    %c0_1 = arith.constant 0 : index
    %c0_2 = arith.constant 0 : index
    %1 = vector.load %arg3[%c0_1, %c0_2] : memref<56x1xf32, #tpu.memory_space<vmem>>, vector<56x1xf32>
    %c0_3 = arith.constant 0 : index
    %c0_4 = arith.constant 0 : index
    %c0_5 = arith.constant 0 : index
    %2 = vector.load %arg1[%c0_3, %c0_4, %c0_5] : memref<2x32x256xf32, #tpu.memory_space<vmem>>, vector<1x32x256xf32>
    %3 = vector.shape_cast %2 : vector<1x32x256xf32> to vector<32x256xf32>
    %4 = arith.truncf %3 : vector<32x256xf32> to vector<32x256xbf16>
    %cst = arith.constant dense<0.000000e+00> : vector<56x256xf32>
    %5 = tpu.matmul %0, %4, %cst {dimension_numbers = #tpu.dot_dimension_numbers<[1], [0], [0], [1], [0, 0, 1, 1], [], []>} : vector<56x32xbf16>, vector<32x256xbf16>, vector<56x256xf32> -> vector<56x256xf32>
    %6 = vector.broadcast %1 : vector<56x1xf32> to vector<56x256xf32>
    %7 = arith.addf %5, %6 : vector<56x256xf32>
    %cst_6 = arith.constant 0.000000e+00 : f32
    %8 = vector.broadcast %cst_6 : f32 to vector<56x256xf32>
    %9 = arith.maximumf %7, %8 : vector<56x256xf32>
    %10 = vector.extract_strided_slice %9 {offsets = [0, 0], sizes = [8, 256], strides = [1, 1]} : vector<56x256xf32> to vector<8x256xf32>
    %11 = arith.truncf %10 : vector<8x256xf32> to vector<8x256xbf16>
    %12 = vector.extract_strided_slice %9 {offsets = [8, 0], sizes = [8, 256], strides = [1, 1]} : vector<56x256xf32> to vector<8x256xf32>
    %13 = arith.truncf %12 : vector<8x256xf32> to vector<8x256xbf16>
    %14 = vector.extract_strided_slice %9 {offsets = [16, 0], sizes = [33, 256], strides = [1, 1]} : vector<56x256xf32> to vector<33x256xf32>
    %15 = arith.truncf %14 : vector<33x256xf32> to vector<33x256xbf16>
    %cst_7 = arith.constant dense<0.000000e+00> : vector<256x256xf32>
    %16 = tpu.matmul %13, %11, %cst_7 {dimension_numbers = #tpu.dot_dimension_numbers<[0], [0], [1], [1], [0, 1, 1, 1], [], []>} : vector<8x256xbf16>, vector<8x256xbf16>, vector<256x256xf32> -> vector<256x256xf32>
    %cst_8 = arith.constant dense<0xFF800000> : vector<256xf32>
    %17 = vector.multi_reduction <maximumf>, %16, %cst_8 [1] : vector<256x256xf32> to vector<256xf32>
    %18 = vector.shape_cast %17 : vector<256xf32> to vector<256x1xf32>
    %19 = vector.broadcast %18 : vector<256x1xf32> to vector<256x256xf32>
    %20 = arith.subf %16, %19 : vector<256x256xf32>
    %21 = math.exp %20 : vector<256x256xf32>
    %22 = arith.truncf %21 : vector<256x256xf32> to vector<256x256xbf16>
    %cst_9 = arith.constant dense<0.000000e+00> : vector<33x256xf32>
    %23 = tpu.matmul %15, %22, %cst_9 {dimension_numbers = #tpu.dot_dimension_numbers<[1], [1], [0], [0], [0, 0, 1, 0], [], []>} : vector<33x256xbf16>, vector<256x256xbf16>, vector<33x256xf32> -> vector<33x256xf32>
    %24 = vector.extract_strided_slice %23 {offsets = [32, 0], sizes = [1, 256], strides = [1, 1]} : vector<33x256xf32> to vector<1x256xf32>
    %25 = vector.extract_strided_slice %23 {offsets = [0, 0], sizes = [32, 256], strides = [1, 1]} : vector<33x256xf32> to vector<32x256xf32>
    %26 = tpu.reciprocal %24 {approx = true} : vector<1x256xf32> -> vector<1x256xf32>
    %27 = vector.broadcast %26 : vector<1x256xf32> to vector<32x256xf32>
    %28 = arith.mulf %25, %27 : vector<32x256xf32>
    %29 = arith.mulf %28, %3 : vector<32x256xf32>
    %c0_10 = arith.constant 0 : index
    %c0_11 = arith.constant 0 : index
    %c0_12 = arith.constant 0 : index
    %30 = vector.load %arg4[%c0_10, %c0_11, %c0_12] : memref<2x32x256xf32, #tpu.memory_space<vmem>>, vector<1x32x256xf32>
    %31 = vector.shape_cast %30 : vector<1x32x256xf32> to vector<32x256xf32>
    %32 = vector.shape_cast %29 : vector<32x256xf32> to vector<1x32x256xf32>
    tpu.vector_store %arg4[%c0_10, %c0_11, %c0_12], %32 {strides = array<i32>} : memref<2x32x256xf32, #tpu.memory_space<vmem>>, vector<1x32x256xf32>,
    %c1 = arith.constant 1 : index
    %c0_13 = arith.constant 0 : index
    %c0_14 = arith.constant 0 : index
    %33 = vector.load %arg1[%c1, %c0_13, %c0_14] : memref<2x32x256xf32, #tpu.memory_space<vmem>>, vector<1x32x256xf32>
    %34 = vector.shape_cast %33 : vector<1x32x256xf32> to vector<32x256xf32>
    %35 = arith.truncf %34 : vector<32x256xf32> to vector<32x256xbf16>
    %cst_15 = arith.constant dense<0.000000e+00> : vector<56x256xf32>
    %36 = tpu.matmul %0, %35, %cst_15 {dimension_numbers = #tpu.dot_dimension_numbers<[1], [0], [0], [1], [0, 0, 1, 1], [], []>} : vector<56x32xbf16>, vector<32x256xbf16>, vector<56x256xf32> -> vector<56x256xf32>
    %37 = vector.broadcast %1 : vector<56x1xf32> to vector<56x256xf32>
    %38 = arith.addf %36, %37 : vector<56x256xf32>
    %cst_16 = arith.constant 0.000000e+00 : f32
    %39 = vector.broadcast %cst_16 : f32 to vector<56x256xf32>
    %40 = arith.maximumf %38, %39 : vector<56x256xf32>
    %41 = vector.extract_strided_slice %40 {offsets = [0, 0], sizes = [8, 256], strides = [1, 1]} : vector<56x256xf32> to vector<8x256xf32>
    %42 = arith.truncf %41 : vector<8x256xf32> to vector<8x256xbf16>
    %43 = vector.extract_strided_slice %40 {offsets = [8, 0], sizes = [8, 256], strides = [1, 1]} : vector<56x256xf32> to vector<8x256xf32>
    %44 = arith.truncf %43 : vector<8x256xf32> to vector<8x256xbf16>
    %45 = vector.extract_strided_slice %40 {offsets = [16, 0], sizes = [33, 256], strides = [1, 1]} : vector<56x256xf32> to vector<33x256xf32>
    %46 = arith.truncf %45 : vector<33x256xf32> to vector<33x256xbf16>
    %cst_17 = arith.constant dense<0.000000e+00> : vector<256x256xf32>
    %47 = tpu.matmul %44, %42, %cst_17 {dimension_numbers = #tpu.dot_dimension_numbers<[0], [0], [1], [1], [0, 1, 1, 1], [], []>} : vector<8x256xbf16>, vector<8x256xbf16>, vector<256x256xf32> -> vector<256x256xf32>
    %cst_18 = arith.constant dense<0xFF800000> : vector<256xf32>
    %48 = vector.multi_reduction <maximumf>, %47, %cst_18 [1] : vector<256x256xf32> to vector<256xf32>
    %49 = vector.shape_cast %48 : vector<256xf32> to vector<256x1xf32>
    %50 = vector.broadcast %49 : vector<256x1xf32> to vector<256x256xf32>
    %51 = arith.subf %47, %50 : vector<256x256xf32>
    %52 = math.exp %51 : vector<256x256xf32>
    %53 = arith.truncf %52 : vector<256x256xf32> to vector<256x256xbf16>
    %cst_19 = arith.constant dense<0.000000e+00> : vector<33x256xf32>
    %54 = tpu.matmul %46, %53, %cst_19 {dimension_numbers = #tpu.dot_dimension_numbers<[1], [1], [0], [0], [0, 0, 1, 0], [], []>} : vector<33x256xbf16>, vector<256x256xbf16>, vector<33x256xf32> -> vector<33x256xf32>
    %55 = vector.extract_strided_slice %54 {offsets = [32, 0], sizes = [1, 256], strides = [1, 1]} : vector<33x256xf32> to vector<1x256xf32>
    %56 = vector.extract_strided_slice %54 {offsets = [0, 0], sizes = [32, 256], strides = [1, 1]} : vector<33x256xf32> to vector<32x256xf32>
    %57 = tpu.reciprocal %55 {approx = true} : vector<1x256xf32> -> vector<1x256xf32>
    %58 = vector.broadcast %57 : vector<1x256xf32> to vector<32x256xf32>
    %59 = arith.mulf %56, %58 : vector<32x256xf32>
    %60 = arith.mulf %59, %34 : vector<32x256xf32>
    %c1_20 = arith.constant 1 : index
    %c0_21 = arith.constant 0 : index
    %c0_22 = arith.constant 0 : index
    %61 = vector.load %arg4[%c1_20, %c0_21, %c0_22] : memref<2x32x256xf32, #tpu.memory_space<vmem>>, vector<1x32x256xf32>
    %62 = vector.shape_cast %61 : vector<1x32x256xf32> to vector<32x256xf32>
    %63 = vector.shape_cast %60 : vector<32x256xf32> to vector<1x32x256xf32>
    tpu.vector_store %arg4[%c1_20, %c0_21, %c0_22], %63 {strides = array<i32>} : memref<2x32x256xf32, #tpu.memory_space<vmem>>, vector<1x32x256xf32>,
    return
  }
  func.func @transform_0(%arg0: i32) -> (i32, i32, i32) {
    %c0_i32 = arith.constant 0 : i32
    %c0_i32_0 = arith.constant 0 : i32
    %c0_i32_1 = arith.constant 0 : i32
    return %arg0, %c0_i32, %c0_i32_0 : i32, i32, i32
  }
  func.func @transform_1(%arg0: i32) -> (i32, i32) {
    %c0_i32 = arith.constant 0 : i32
    %c0_i32_0 = arith.constant 0 : i32
    %c0_i32_1 = arith.constant 0 : i32
    return %c0_i32, %c0_i32_0 : i32, i32
  }
  func.func @transform_2(%arg0: i32) -> (i32, i32) {
    %c0_i32 = arith.constant 0 : i32
    %c0_i32_0 = arith.constant 0 : i32
    %c0_i32_1 = arith.constant 0 : i32
    return %c0_i32, %c0_i32_0 : i32, i32
  }
  func.func @transform_3(%arg0: i32) -> (i32, i32, i32) {
    %c0_i32 = arith.constant 0 : i32
    %c0_i32_0 = arith.constant 0 : i32
    %c0_i32_1 = arith.constant 0 : i32
    return %arg0, %c0_i32, %c0_i32_0 : i32, i32, i32
  }
}

</mosaic_0001>

<bundles_post_ra>
// kernel: tpu_custom_call.1
= control target key start
LH: loop header
LB: loop body
LE: loop exit
PB: predicated region body
PF: predicated region fallthrough
CT: control target
= control target key end

     0   :  { %8 = vsyncpa [#allocation3], 0  ;;  %s2958_s0 = inlined_call_operand.hbm [shape: f32[2,32,256], index: 0, kind: input, shape index: {}]   ;;  %s2959_s1 = inlined_call_operand.vmem [shape: bf16[56,32], index: 1, kind: input, shape index: {}]   ;;  %s2960_s2 = inlined_call_operand.vmem [shape: f32[56,1], index: 2, kind: input, shape index: {}]   ;;  %s2961_s3 = inlined_call_operand.hbm [shape: f32[2,32,256], index: 3, kind: output, shape index: {}]  }
   0x1   :  { %9 = vsyncpa [#allocation4], 0  ;;  %s2114_s12 = smov [#allocation2]  }
   0x2   :  { %s15_s13 = sshll.u32 %s2114_s12, 4  ;;  %s16_s13 = int_to_ptr.vmem [resolvable:$true] %s15_s13 }
   0x3   :  { %s2078_s14 = scalar_lea.vmem %s16_s13, 2048  ;;  %p2083_p1 = scmp.lt.s32.totalorder %s16_s13, %s16_s13 }
   0x4   :  { %p2079_p0 = scmp.ne.s32.totalorder %s16_s13, %s2078_s14  ;;  %p2084_p2 = scmp.lt.s32.totalorder %s2078_s14, %s2078_s14 }
   0x6   :  { %p2085_p3 = por %p2084_p2, %p2083_p1 }
   0x8   :  { %p2086_p4 = pnand %p2085_p3, %p2079_p0 }
   0xa   :  { %2089 = shalt.err (!%p2086_p4)
}
   0xb   :  { %s2115_s15 = smov 256   ;;  %s2116_s16 = smov 16  }
   0xc   :  { %21 = dma.hbm_to_vmem [thread:$0]  %s2958_s0, 2048, %s16_s13, [#allocation3], %s2115_s15, %s2115_s15, %s2116_s16  }
   0xd   :  { %2110 = dma.done.wait [#allocation3], 2048  }
   0xe   :  { %2111 = vsyncadd [#allocation3], 4294965248  ;;  %v2117_v0 = vmov 0   ;;  %v49_v1 = vld [vmem:[#allocation2 + $0x28] sm:$0xff]  ;;  %v51_v2 = vld [vmem:[#allocation2 + $0x38] sm:$0xff]  ;;  %vm109_vm0 = vcmask 261120  }
   0xf   :  { %154 = vmatprep.mubr.bf16.mxu1 %v2117_v0  ;;  %958 = vmatprep.mubr.bf16.mxu0 %v2117_v0  ;;  %v919_v3 = vld [vmem:[#allocation2 + $0x68] sm:$0xff]  ;;  %v55_v4 = vpack.c.bf16 %v51_v2, %v49_v1  ;;  %v921_v5 = vld [vmem:[#allocation2 + $0x78] sm:$0xff]  ;;  %v48_v6 = vld [vmem:[#allocation2 + $0x20] sm:$0xff]  ;;  %vm298_vm1 = vcmask 1043456   ;;  %vm249_vm2 = vcmask 64512  }
  0x10   :  { %1784 = vset.pattern.permute.xlu0 %v2117_v0  ;;  %v50_v7 = vld [vmem:[#allocation2 + $0x30] sm:$0xff]  ;;  %v925_v8 = vpack.c.bf16 %v921_v5, %v919_v3  ;;  %v918_v10 = vld [vmem:[#allocation2 + $0x60] sm:$0xff]  ;;  %v45_v12 = vld [vmem:[#allocation2 + $0x8] sm:$0xff] }
  0x11   :  { %v54_v9 = vpack.c.bf16 %v50_v7, %v48_v6  ;;  %v920_v11 = vld [vmem:[#allocation2 + $0x70] sm:$0xff]  ;;  %134 = vmatprep.subr.bf16.mxu1 %v55_v4  ;;  %v47_v14 = vld [vmem:[#allocation2 + $0x18] sm:$0xff]  ;;  %v915_v15 = vld [vmem:[#allocation2 + $0x48] sm:$0xff] }
  0x12   :  { %v924_v13 = vpack.c.bf16 %v920_v11, %v918_v10  ;;  %v917_v16 = vld [vmem:[#allocation2 + $0x58] sm:$0xff]  ;;  %938 = vmatprep.subr.bf16.mxu0 %v925_v8  ;;  %v53_v17 = vpack.c.bf16 %v47_v14, %v45_v12  ;;  %v44_v19 = vld [vmem:[#allocation2] sm:$0xff]  ;;  %v46_v20 = vld [vmem:[#allocation2 + $0x10] sm:$0xff] }
  0x13   :  { %135 = vmatpush1.bf16.msra.mxu1 %v54_v9  ;;  %v923_v18 = vpack.c.bf16 %v917_v16, %v915_v15  ;;  %v914_v21 = vld [vmem:[#allocation2 + $0x40] sm:$0xff]  ;;  %v52_v22 = vpack.c.bf16 %v46_v20, %v44_v19  ;;  %v916_v23 = vld [vmem:[#allocation2 + $0x50] sm:$0xff]  ;;  %v38_v26 = vld [vmem:[%s2960_s2 + $0x8] sm:$0xff] }
  0x14   :  { %939 = vmatpush1.bf16.msra.mxu0 %v924_v13  ;;  %136 = vmatprep.subr.bf16.mxu1 %v53_v17  ;;  %v922_v24 = vpack.c.bf16 %v916_v23, %v914_v21  ;;  %v1786_v25 = vld [vmem:[%s2959_s1] sm:$0xff]   ;;  %v1787_v28 = vld [vmem:[%s2959_s1 + $0x8] sm:$0xff]   ;;  %v1788_v29 = vld [vmem:[%s2959_s1 + $0x10] sm:$0xff]  }
  0x15   :  { %940 = vmatprep.subr.bf16.mxu0 %v923_v18  ;;  %63 = vperm.xlu0 %1784, %v38_v26   ;;  %v37_v27 = vld [vmem:[%s2960_s2] sm:$0xff]  ;;  %v1789_v30 = vld [vmem:[%s2959_s1 + $0x18] ss:$0 sps:$4 sm:$0xff]  }
  0x17   :  { %137 = vmatpush1.bf16.msra.mxu1 %v52_v22 }
  0x18   :  { %941 = vmatpush1.bf16.msra.mxu0 %v922_v24 }
  0x19   :  { %58 = vperm.xlu0 %1784, %v37_v27  }
  0x1a   :  { %1737 = vmatmul.mubr.msk.bf16.vlgmr.msra.gmra.mxu1 %vm109_vm0, %v1786_v25 }
  0x1b   :  { %1758 = vmatmul.mubr.msk.bf16.vlgmr.msra.gmra.mxu0 %vm109_vm0, %v1786_v25  ;;  %164 = vmatprep.mubr.bf16.mxu1 %v2117_v0 }
  0x1c   :  { %968 = vmatprep.mubr.bf16.mxu0 %v2117_v0 }
  0x22   :  { %1738 = vmatmul.mubr.msk.bf16.gmra.mxu1 %vm109_vm0, %v1787_v28 }
  0x23   :  { %1759 = vmatmul.mubr.msk.bf16.gmra.mxu0 %vm109_vm0, %v1787_v28  ;;  %174 = vmatprep.mubr.bf16.mxu1 %v2117_v0 }
  0x24   :  { %978 = vmatprep.mubr.bf16.mxu0 %v2117_v0 }
  0x2a   :  { %1739 = vmatmul.mubr.msk.bf16.gmra.mxu1 %vm109_vm0, %v1788_v29 }
  0x2b   :  { %1760 = vmatmul.mubr.msk.bf16.gmra.mxu0 %vm109_vm0, %v1788_v29  ;;  %184 = vmatprep.mubr.bf16.mxu1 %v2117_v0 }
  0x2c   :  { %988 = vmatprep.mubr.bf16.mxu0 %v2117_v0 }
  0x32   :  { %1740 = vmatmul.mubr.msk.bf16.gmra.mxu1 %vm109_vm0, %v1789_v30 }
  0x33   :  { %1761 = vmatmul.mubr.msk.bf16.gmra.mxu0 %vm109_vm0, %v1789_v30  ;;  %337 = vmatprep.mubr.bf16.mxu1 %v2117_v0 }
  0x34   :  { %1139 = vmatprep.mubr.bf16.mxu0 %v2117_v0 }
  0x90   :  { %v64_v31 = vpop.permute.xlu0 %63 }
  0x94   :  { %v59_v32 = vpop.permute.xlu0 %58 }
  0xda   :  { %v156_v33 = vpop.f32.mrf.mxu1 }
  0xdb   :  { %v157_v34 = vadd.f32 %v156_v33, %v59_v32  ;;  %v960_v35 = vpop.f32.mrf.mxu0 }
  0xdc   :  { %v961_v36 = vadd.f32 %v960_v35, %v59_v32  ;;  %v158_v37 = vpop.f32.mrf.mxu1 }
  0xdd   :  { %v193_v38 = vmax.f32 %v157_v34, 0.0  ;;  %v159_v39 = vadd.f32 %v158_v37, %v59_v32  ;;  %v962_v40 = vpop.f32.mrf.mxu0 }
  0xde   :  { %v997_v41 = vmax.f32 %v961_v36, 0.0  ;;  %v963_v42 = vadd.f32 %v962_v40, %v59_v32  ;;  %v160_v43 = vpop.f32.mrf.mxu1 }
  0xdf   :  { %v207_v44 = vpack.c.bf16 %v193_v38, %v193_v38  ;;  %v194_v45 = vmax.f32 %v159_v39, 0.0  ;;  %v161_v46 = vadd.f32 %v160_v43, %v64_v31  ;;  %v964_v59 = vpop.f32.mrf.mxu0 }
  0xe0   :  { %v1011_v47 = vpack.c.bf16 %v997_v41, %v997_v41  ;;  %v998_v48 = vmax.f32 %v963_v42, 0.0  ;;  %v162_v49 = vpop.f32.mrf.mxu1  ;;  %v965_v60 = vadd.f32 %v964_v59, %v64_v31 }
  0xe1   :  { %v208_v50 = vpack.c.bf16 %v194_v45, %v194_v45  ;;  %v163_v51 = vadd.f32 %v162_v49, %v64_v31  ;;  %v195_v52 = vmax.f32 %v161_v46, 0.0  ;;  %v300_v56 = vsel %vm298_vm1, %v207_v44, 0  ;;  %v966_v63 = vpop.f32.mrf.mxu0 }
  0xe2   :  { %v1012_v53 = vpack.c.bf16 %v998_v48, %v998_v48  ;;  %v1102_v54 = vsel %vm298_vm1, %v1011_v47, 0  ;;  %v999_v61 = vmax.f32 %v965_v60, 0.0  ;;  %v967_v1 = vadd.f32 %v966_v63, %v64_v31  ;;  %v2191_v11 = vpop.f32.mrf.mxu1 }
  0xe3   :  { %v196_v55 = vmax.f32 %v163_v51, 0.0  ;;  %1741 = vmatprep.subr.msk.bf16.mxu1 %vm298_vm1, %v208_v50  ;;  %v209_v57 = vpack.c.bf16 %v195_v52, %v195_v52  ;;  %3059 = vst [vmem:[#allocation8_spill] sm:$0xff] %v2191_v11  ;;  %v2231_v30 = vpop.f32.mrf.mxu0 }
  0xe4   :  { %320 = vmatpush1.bf16.msra.mxu1 %v300_v56  ;;  %1762 = vmatprep.subr.msk.bf16.mxu0 %vm298_vm1, %v1012_v53  ;;  %v1013_v62 = vpack.c.bf16 %v999_v61, %v999_v61  ;;  %v1000_v2 = vmax.f32 %v967_v1, 0.0  ;;  %v2193_v13 = vpop.f32.mrf.mxu1  ;;  %3069 = vst [vmem:[#allocation18_spill] sm:$0xff] %v2231_v30 }
  0xe5   :  { %v210_v58 = vpack.c.bf16 %v196_v55, %v196_v55  ;;  %217 = vxpose.xlu1.c.b16.start.end [1/1] (short) %v209_v57, 128  ;;  %1122 = vmatpush1.bf16.msra.mxu0 %v1102_v54  ;;  %3060 = vst [vmem:[#allocation9_spill] sm:$0xff] %v2193_v13  ;;  %v2233_v31 = vpop.f32.mrf.mxu0 }
  0xe6   :  { %v1014_v3 = vpack.c.bf16 %v1000_v2, %v1000_v2  ;;  %v2195_v14 = vpop.f32.mrf.mxu1  ;;  %3070 = vst [vmem:[#allocation19_spill] sm:$0xff] %v2233_v31 }
  0xe7   :  { %233 = vxpose.xlu0.c.b16.start.end [1/1] (short) %v210_v58, 128  ;;  %3061 = vst [vmem:[#allocation10_spill] sm:$0xff] %v2195_v14  ;;  %v2235_v34 = vpop.f32.mrf.mxu0 }
  0xe8   :  { %v2197_v16 = vpop.f32.mrf.mxu1  ;;  %3071 = vst [vmem:[#allocation20_spill] sm:$0xff] %v2235_v34 }
  0xe9   :  { %3062 = vst [vmem:[#allocation11_spill] sm:$0xff] %v2197_v16  ;;  %v2239_v35 = vpop.f32.mrf.mxu0 }
  0xea   :  { %v2203_v17 = vpop.f32.mrf.mxu1  ;;  %3072 = vst [vmem:[#allocation21_spill] sm:$0xff] %v2239_v35 }
  0xeb   :  { %3063 = vst [vmem:[#allocation12_spill] sm:$0xff] %v2203_v17  ;;  %v2243_v36 = vpop.f32.mrf.mxu0 }
  0xec   :  { %v2205_v18 = vpop.f32.mrf.mxu1  ;;  %3073 = vst [vmem:[#allocation22_spill] sm:$0xff] %v2243_v36 }
  0xed   :  { %3064 = vst [vmem:[#allocation13_spill] sm:$0xff] %v2205_v18  ;;  %v2245_v37 = vpop.f32.mrf.mxu0 }
  0xee   :  { %v2207_v20 = vpop.f32.mrf.mxu1  ;;  %3074 = vst [vmem:[#allocation23_spill] sm:$0xff] %v2245_v37 }
  0xef   :  { %3065 = vst [vmem:[#allocation14_spill] sm:$0xff] %v2207_v20  ;;  %v2247_v40 = vpop.f32.mrf.mxu0 }
  0xf0   :  { %v2209_v21 = vpop.f32.mrf.mxu1  ;;  %3075 = vst [vmem:[#allocation24_spill] sm:$0xff] %v2247_v40 }
  0xf1   :  { %3066 = vst [vmem:[#allocation15_spill] sm:$0xff] %v2209_v21  ;;  %v2251_v41 = vpop.f32.mrf.mxu0 }
  0xf2   :  { %v2215_v22 = vpop.f32.mrf.mxu1  ;;  %3076 = vst [vmem:[#allocation25_spill] sm:$0xff] %v2251_v41 }
  0xf3   :  { %3067 = vst [vmem:[#allocation16_spill] sm:$0xff] %v2215_v22  ;;  %v2255_v42 = vpop.f32.mrf.mxu0 }
  0xf4   :  { %v2217_v23 = vpop.f32.mrf.mxu1  ;;  %3077 = vst [vmem:[#allocation26_spill] sm:$0xff] %v2255_v42 }
  0xf5   :  { %3068 = vst [vmem:[#allocation17_spill] sm:$0xff] %v2217_v23  ;;  %v2257_v43 = vpop.f32.mrf.mxu0 }
  0xf6   :  { %v190_v25 = vpop.f32.mrf.mxu1  ;;  %3078 = vst [vmem:[#allocation27_spill] sm:$0xff] %v2257_v43 }
  0xf7   :  { %v994_v46 = vpop.f32.mrf.mxu0 }
  0xf8   :  { %v191_v26 = vpop.f32.mrf.mxu1 }
  0xf9   :  { %v995_v47 = vpop.f32.mrf.mxu0 }
 0x102   :  { %1021 = vxpose.xlu1.c.b16.start.end [1/1] (short) %v1013_v62, 128 }
 0x11f   :  { %1037 = vxpose.xlu1.c.b16.start.end [1/1] (short) %v1014_v3, 128 }
 0x123   :  { %1785 = vset.pattern.permute.xlu1 %v2117_v0 }
 0x147   :  { %v225_v4 = vpop.trf.xlu1 }
 0x148   :  { %1742 = vmatmul.mubr.msk.bf16.vlgmr.msra.gmra.mxu1 %vm249_vm2, %v225_v4 }
 0x149   :  { %347 = vmatprep.mubr.bf16.mxu1 %v2117_v0  ;;  %v241_v29 = vpop.trf.xlu0 }
 0x14b   :  { %v226_v5 = vpop.trf.xlu1 }
 0x14d   :  { %v242_v33 = vpop.trf.xlu0 }
 0x14f   :  { %v227_v6 = vpop.trf.xlu1 }
 0x150   :  { %1743 = vmatmul.mubr.msk.bf16.gmra.mxu1 %vm249_vm2, %v226_v5 }
 0x151   :  { %357 = vmatprep.mubr.bf16.mxu1 %v2117_v0  ;;  %v243_v39 = vpop.trf.xlu0 }
 0x153   :  { %v228_v7 = vpop.trf.xlu1 }
 0x155   :  { %v244_v45 = vpop.trf.xlu0 }
 0x157   :  { %v229_v8 = vpop.trf.xlu1 }
 0x158   :  { %1744 = vmatmul.mubr.msk.bf16.gmra.mxu1 %vm249_vm2, %v227_v6 }
 0x159   :  { %367 = vmatprep.mubr.bf16.mxu1 %v2117_v0  ;;  %v245_v49 = vpop.trf.xlu0 }
 0x15b   :  { %v230_v9 = vpop.trf.xlu1 }
 0x15d   :  { %v246_v51 = vpop.trf.xlu0 }
 0x15f   :  { %v231_v10 = vpop.trf.xlu1 }
 0x160   :  { %1745 = vmatmul.mubr.msk.bf16.gmra.mxu1 %vm249_vm2, %v228_v7 }
 0x161   :  { %377 = vmatprep.mubr.bf16.mxu1 %v2117_v0  ;;  %v247_v53 = vpop.trf.xlu0 }
 0x163   :  { %v232_v12 = vpop.trf.xlu1 }
 0x165   :  { %v248_v55 = vpop.trf.xlu0 }
 0x167   :  { %v1029_v15 = vpop.trf.xlu1 }
 0x168   :  { %1746 = vmatmul.mubr.msk.bf16.gmra.mxu1 %vm249_vm2, %v229_v8  ;;  %1763 = vmatmul.mubr.msk.bf16.vlgmr.msra.gmra.mxu0 %vm249_vm2, %v1029_v15 }
 0x169   :  { %1149 = vmatprep.mubr.bf16.mxu0 %v2117_v0  ;;  %387 = vmatprep.mubr.bf16.mxu1 %v2117_v0 }
 0x16b   :  { %v1030_v19 = vpop.trf.xlu1 }
 0x16f   :  { %v1031_v24 = vpop.trf.xlu1 }
 0x170   :  { %1747 = vmatmul.mubr.msk.bf16.gmra.mxu1 %vm249_vm2, %v230_v9  ;;  %1764 = vmatmul.mubr.msk.bf16.gmra.mxu0 %vm249_vm2, %v1030_v19 }
 0x171   :  { %1159 = vmatprep.mubr.bf16.mxu0 %v2117_v0  ;;  %397 = vmatprep.mubr.bf16.mxu1 %v2117_v0 }
 0x173   :  { %v1032_v27 = vpop.trf.xlu1 }
 0x177   :  { %v1033_v28 = vpop.trf.xlu1 }
 0x178   :  { %1748 = vmatmul.mubr.msk.bf16.gmra.mxu1 %vm249_vm2, %v231_v10  ;;  %1765 = vmatmul.mubr.msk.bf16.gmra.mxu0 %vm249_vm2, %v1031_v24 }
 0x179   :  { %1169 = vmatprep.mubr.bf16.mxu0 %v2117_v0  ;;  %407 = vmatprep.mubr.bf16.mxu1 %v2117_v0 }
 0x17b   :  { %v1034_v32 = vpop.trf.xlu1 }
 0x17f   :  { %v1035_v38 = vpop.trf.xlu1 }
 0x180   :  { %1749 = vmatmul.mubr.msk.bf16.gmra.mxu1 %vm249_vm2, %v232_v12  ;;  %1766 = vmatmul.mubr.msk.bf16.gmra.mxu0 %vm249_vm2, %v1032_v27 }
 0x181   :  { %1179 = vmatprep.mubr.bf16.mxu0 %v2117_v0  ;;  %417 = vmatprep.mubr.bf16.mxu1 %v2117_v0 }
 0x183   :  { %v1036_v44 = vpop.trf.xlu1 }
 0x187   :  { %v1045_v48 = vpop.trf.xlu1 }
 0x188   :  { %1767 = vmatmul.mubr.msk.bf16.gmra.mxu0 %vm249_vm2, %v1033_v28  ;;  %1750 = vmatmul.mubr.msk.bf16.gmra.mxu1 %vm249_vm2, %v241_v29 }
 0x189   :  { %1189 = vmatprep.mubr.bf16.mxu0 %v2117_v0  ;;  %427 = vmatprep.mubr.bf16.mxu1 %v2117_v0 }
 0x18b   :  { %v1046_v50 = vpop.trf.xlu1 }
 0x18f   :  { %v1047_v52 = vpop.trf.xlu1 }
 0x190   :  { %1768 = vmatmul.mubr.msk.bf16.gmra.mxu0 %vm249_vm2, %v1034_v32  ;;  %1751 = vmatmul.mubr.msk.bf16.gmra.mxu1 %vm249_vm2, %v242_v33 }
 0x191   :  { %1199 = vmatprep.mubr.bf16.mxu0 %v2117_v0  ;;  %437 = vmatprep.mubr.bf16.mxu1 %v2117_v0 }
 0x193   :  { %v1048_v54 = vpop.trf.xlu1 }
 0x197   :  { %v1049_v56 = vpop.trf.xlu1 }
 0x198   :  { %1769 = vmatmul.mubr.msk.bf16.gmra.mxu0 %vm249_vm2, %v1035_v38  ;;  %1752 = vmatmul.mubr.msk.bf16.gmra.mxu1 %vm249_vm2, %v243_v39 }
 0x199   :  { %1209 = vmatprep.mubr.bf16.mxu0 %v2117_v0  ;;  %447 = vmatprep.mubr.bf16.mxu1 %v2117_v0 }
 0x19b   :  { %v1050_v57 = vpop.trf.xlu1 }
 0x19f   :  { %v1051_v58 = vpop.trf.xlu1 }
 0x1a0   :  { %1770 = vmatmul.mubr.msk.bf16.gmra.mxu0 %vm249_vm2, %v1036_v44  ;;  %1753 = vmatmul.mubr.msk.bf16.gmra.mxu1 %vm249_vm2, %v244_v45 }
 0x1a1   :  { %1219 = vmatprep.mubr.bf16.mxu0 %v2117_v0  ;;  %457 = vmatprep.mubr.bf16.mxu1 %v2117_v0 }
 0x1a3   :  { %v1052_v59 = vpop.trf.xlu1 }
 0x1a8   :  { %1771 = vmatmul.mubr.msk.bf16.gmra.mxu0 %vm249_vm2, %v1045_v48  ;;  %1754 = vmatmul.mubr.msk.bf16.gmra.mxu1 %vm249_vm2, %v245_v49 }
 0x1a9   :  { %1229 = vmatprep.mubr.bf16.mxu0 %v2117_v0  ;;  %467 = vmatprep.mubr.bf16.mxu1 %v2117_v0 }
 0x1b0   :  { %1772 = vmatmul.mubr.msk.bf16.gmra.mxu0 %vm249_vm2, %v1046_v50  ;;  %1755 = vmatmul.mubr.msk.bf16.gmra.mxu1 %vm249_vm2, %v246_v51 }
 0x1b1   :  { %1239 = vmatprep.mubr.bf16.mxu0 %v2117_v0  ;;  %477 = vmatprep.mubr.bf16.mxu1 %v2117_v0 }
 0x1b8   :  { %1773 = vmatmul.mubr.msk.bf16.gmra.mxu0 %vm249_vm2, %v1047_v52  ;;  %1756 = vmatmul.mubr.msk.bf16.gmra.mxu1 %vm249_vm2, %v247_v53 }
 0x1b9   :  { %1249 = vmatprep.mubr.bf16.mxu0 %v2117_v0  ;;  %487 = vmatprep.mubr.bf16.mxu1 %v2117_v0 }
 0x1c0   :  { %1774 = vmatmul.mubr.msk.bf16.gmra.mxu0 %vm249_vm2, %v1048_v54  ;;  %1757 = vmatmul.mubr.msk.bf16.gmra.mxu1 %vm249_vm2, %v248_v55 }
 0x1c1   :  { %1259 = vmatprep.mubr.bf16.mxu0 %v2117_v0 }
 0x1c8   :  { %1775 = vmatmul.mubr.msk.bf16.gmra.mxu0 %vm249_vm2, %v1049_v56 }
 0x1c9   :  { %1269 = vmatprep.mubr.bf16.mxu0 %v2117_v0 }
 0x1d0   :  { %1776 = vmatmul.mubr.msk.bf16.gmra.mxu0 %vm249_vm2, %v1050_v57 }
 0x1d1   :  { %1279 = vmatprep.mubr.bf16.mxu0 %v2117_v0 }
 0x1d8   :  { %1777 = vmatmul.mubr.msk.bf16.gmra.mxu0 %vm249_vm2, %v1051_v58 }
 0x1d9   :  { %1289 = vmatprep.mubr.bf16.mxu0 %v2117_v0 }
 0x1e0   :  { %1778 = vmatmul.mubr.msk.bf16.gmra.mxu0 %vm249_vm2, %v1052_v59 }
 0x208   :  { %v2285_v60 = vpop.f32.mrf.mxu1 }
 0x209   :  { %3079 = vst [vmem:[#allocation28_spill] sm:$0xff] %v2285_v60 }
 0x20a   :  { %v2287_v61 = vpop.f32.mrf.mxu1 }
 0x20b   :  { %3080 = vst [vmem:[#allocation29_spill] sm:$0xff] %v2287_v61 }
 0x20c   :  { %v2289_v62 = vpop.f32.mrf.mxu1 }
 0x20d   :  { %3081 = vst [vmem:[#allocation30_spill] sm:$0xff] %v2289_v62 }
 0x20e   :  { %v2291_v63 = vpop.f32.mrf.mxu1 }
 0x20f   :  { %3082 = vst [vmem:[#allocation31_spill] sm:$0xff] %v2291_v63 }
 0x210   :  { %v2293_v1 = vpop.f32.mrf.mxu1 }
 0x211   :  { %3083 = vst [vmem:[#allocation32_spill] sm:$0xff] %v2293_v1 }
 0x212   :  { %v2295_v2 = vpop.f32.mrf.mxu1 }
 0x213   :  { %3084 = vst [vmem:[#allocation33_spill] sm:$0xff] %v2295_v2 }
 0x214   :  { %v2297_v3 = vpop.f32.mrf.mxu1 }
 0x215   :  { %3085 = vst [vmem:[#allocation34_spill] sm:$0xff] %v2297_v3 }
 0x216   :  { %v2299_v4 = vpop.f32.mrf.mxu1 }
 0x217   :  { %3086 = vst [vmem:[#allocation35_spill] sm:$0xff] %v2299_v4 }
 0x218   :  { %v2301_v0 = vpop.f32.mrf.mxu1 }
 0x219   :  { %3087 = vst [vmem:[#allocation36_spill] sm:$0xff] %v2301_v0 }
 0x21a   :  { %v2303_v5 = vpop.f32.mrf.mxu1 }
 0x21b   :  { %3088 = vst [vmem:[#allocation37_spill] sm:$0xff] %v2303_v5 }
 0x21c   :  { %v2305_v6 = vpop.f32.mrf.mxu1 }
 0x21d   :  { %3089 = vst [vmem:[#allocation38_spill] sm:$0xff] %v2305_v6 }
 0x21e   :  { %v2307_v7 = vpop.f32.mrf.mxu1 }
 0x21f   :  { %3090 = vst [vmem:[#allocation39_spill] sm:$0xff] %v2307_v7 }
 0x220   :  { %v2309_v8 = vpop.f32.mrf.mxu1 }
 0x221   :  { %3091 = vst [vmem:[#allocation40_spill] sm:$0xff] %v2309_v8 }
 0x222   :  { %v2311_v9 = vpop.f32.mrf.mxu1 }
 0x223   :  { %3092 = vst [vmem:[#allocation41_spill] sm:$0xff] %v2311_v9 }
 0x224   :  { %v2313_v10 = vpop.f32.mrf.mxu1 }
 0x225   :  { %3093 = vst [vmem:[#allocation42_spill] sm:$0xff] %v2313_v10 }
 0x226   :  { %v2315_v12 = vpop.f32.mrf.mxu1 }
 0x227   :  { %3094 = vst [vmem:[#allocation43_spill] sm:$0xff] %v2315_v12 }
 0x228   :  { %v2317_v15 = vpop.f32.mrf.mxu1  ;;  %v2319_v19 = vpop.f32.mrf.mxu0 }
 0x22a   :  { %v2321_v24 = vpop.f32.mrf.mxu1  ;;  %v2323_v25 = vpop.f32.mrf.mxu0 }
 0x22b   :  { %3095 = vst [vmem:[#allocation44_spill] sm:$0xff] %v2321_v24  ;;  %3096 = vst [vmem:[#allocation45_spill] sm:$0xff] %v2323_v25 }
 0x22c   :  { %v2325_v26 = vpop.f32.mrf.mxu1  ;;  %v2327_v27 = vpop.f32.mrf.mxu0 }
 0x22d   :  { %3097 = vst [vmem:[#allocation46_spill] sm:$0xff] %v2325_v26  ;;  %3098 = vst [vmem:[#allocation47_spill] sm:$0xff] %v2327_v27 }
 0x22e   :  { %v2329_v28 = vpop.f32.mrf.mxu1  ;;  %v2331_v29 = vpop.f32.mrf.mxu0 }
 0x22f   :  { %3099 = vst [vmem:[#allocation48_spill] sm:$0xff] %v2329_v28  ;;  %3100 = vst [vmem:[#allocation49_spill] sm:$0xff] %v2331_v29 }
 0x230   :  { %v2333_v32 = vpop.f32.mrf.mxu1  ;;  %v2335_v33 = vpop.f32.mrf.mxu0 }
 0x231   :  { %3101 = vst [vmem:[#allocation50_spill] sm:$0xff] %v2333_v32  ;;  %3102 = vst [vmem:[#allocation51_spill] sm:$0xff] %v2335_v33 }
 0x232   :  { %v2337_v38 = vpop.f32.mrf.mxu1  ;;  %v2339_v39 = vpop.f32.mrf.mxu0 }
 0x233   :  { %3103 = vst [vmem:[#allocation52_spill] sm:$0xff] %v2337_v38  ;;  %3104 = vst [vmem:[#allocation53_spill] sm:$0xff] %v2339_v39 }
 0x234   :  { %v2341_v44 = vpop.f32.mrf.mxu1  ;;  %v2343_v45 = vpop.f32.mrf.mxu0 }
 0x235   :  { %3105 = vst [vmem:[#allocation54_spill] sm:$0xff] %v2341_v44  ;;  %3106 = vst [vmem:[#allocation55_spill] sm:$0xff] %v2343_v45 }
 0x236   :  { %v2345_v46 = vpop.f32.mrf.mxu1  ;;  %v2347_v47 = vpop.f32.mrf.mxu0 }
 0x237   :  { %3107 = vst [vmem:[#allocation56_spill] sm:$0xff] %v2345_v46  ;;  %3108 = vst [vmem:[#allocation57_spill] sm:$0xff] %v2347_v47  ;;  %v531_v41 = vmax.f32 %v2341_v44, %v2345_v46 }
 0x238   :  { %v2349_v48 = vpop.f32.mrf.mxu1  ;;  %v2351_v49 = vpop.f32.mrf.mxu0 }
 0x239   :  { %3109 = vst [vmem:[#allocation58_spill] sm:$0xff] %v2349_v48  ;;  %3110 = vst [vmem:[#allocation59_spill] sm:$0xff] %v2351_v49 }
 0x23a   :  { %v2353_v50 = vpop.f32.mrf.mxu1  ;;  %v2355_v51 = vpop.f32.mrf.mxu0 }
 0x23b   :  { %3111 = vst [vmem:[#allocation60_spill] sm:$0xff] %v2353_v50  ;;  %3112 = vst [vmem:[#allocation61_spill] sm:$0xff] %v2355_v51  ;;  %v534_v52 = vmax.f32 %v2349_v48, %v2353_v50 }
 0x23c   :  { %v2359_v53 = vpop.f32.mrf.mxu1  ;;  %v2361_v54 = vpop.f32.mrf.mxu0 }
 0x23d   :  { %3113 = vst [vmem:[#allocation62_spill] sm:$0xff] %v2359_v53  ;;  %3114 = vst [vmem:[#allocation63_spill] sm:$0xff] %v2361_v54  ;;  %535 = vmax.xlane.f32.xlu0 %v534_v52 }
 0x23e   :  { %v2363_v55 = vpop.f32.mrf.mxu1  ;;  %v2365_v56 = vpop.f32.mrf.mxu0 }
 0x23f   :  { %3115 = vst [vmem:[#allocation64_spill] sm:$0xff] %v2365_v56  ;;  %v537_v57 = vmax.f32 %v2359_v53, %v2363_v55  ;;  %v525_v53 = vmax.f32 %v2325_v26, %v2329_v28 }
 0x240   :  { %v2369_v58 = vpop.f32.mrf.mxu1  ;;  %v2371_v59 = vpop.f32.mrf.mxu0 }
 0x241   :  { %3116 = vst [vmem:[#allocation65_spill] sm:$0xff] %v2371_v59  ;;  %538 = vmax.xlane.f32.xlu0 %v537_v57 }
 0x242   :  { %v2373_v42 = vpop.f32.mrf.mxu1  ;;  %v2375_v22 = vpop.f32.mrf.mxu0 }
 0x243   :  { %3117 = vst [vmem:[#allocation66_spill] sm:$0xff] %v2373_v42  ;;  %3118 = vst [vmem:[#allocation67_spill] sm:$0xff] %v2375_v22  ;;  %v540_v36 = vmax.f32 %v2369_v58, %v2373_v42 }
 0x244   :  { %v2379_v52 = vpop.f32.mrf.mxu1  ;;  %v2381_v43 = vpop.f32.mrf.mxu0 }
 0x245   :  { %3119 = vst [vmem:[#allocation68_spill] sm:$0xff] %v2379_v52  ;;  %3120 = vst [vmem:[#allocation69_spill] sm:$0xff] %v2381_v43  ;;  %541 = vmax.xlane.f32.xlu0 %v540_v36 }
 0x246   :  { %v2383_v40 = vpop.f32.mrf.mxu1  ;;  %v2385_v17 = vpop.f32.mrf.mxu0 }
 0x247   :  { %3121 = vst [vmem:[#allocation70_spill] sm:$0xff] %v2383_v40  ;;  %3122 = vst [vmem:[#allocation71_spill] sm:$0xff] %v2385_v17  ;;  %v543_v23 = vmax.f32 %v2379_v52, %v2383_v40  ;;  %v1321_v42 = vmax.f32 %v2381_v43, %v2385_v17  ;;  %v1315_v43 = vmax.f32 %v2361_v54, %v2365_v56 }
 0x248   :  { %v2389_v57 = vpop.f32.mrf.mxu0  ;;  %v2391_v20 = vpop.f32.mrf.mxu1  ;;  %v1309_v54 = vmax.f32 %v2343_v45, %v2347_v47  ;;  %v1303_v45 = vmax.f32 %v2327_v27, %v2331_v29  ;;  %v1318_v29 = vmax.f32 %v2371_v59, %v2375_v22 }
 0x249   :  { %3123 = vst [vmem:[#allocation72_spill] sm:$0xff] %v2389_v57  ;;  %3124 = vst [vmem:[#allocation73_spill] sm:$0xff] %v2391_v20  ;;  %544 = vmax.xlane.f32.xlu1 %v543_v23 }
 0x24a   :  { %v2393_v37 = vpop.f32.mrf.mxu0  ;;  %v2395_v34 = vpop.f32.mrf.mxu1 }
 0x24b   :  { %3125 = vst [vmem:[#allocation74_spill] sm:$0xff] %v2393_v37  ;;  %3126 = vst [vmem:[#allocation75_spill] sm:$0xff] %v2395_v34 }
 0x24c   :  { %v2399_v36 = vpop.f32.mrf.mxu0  ;;  %v2401_v30 = vpop.f32.mrf.mxu1 }
 0x24d   :  { %3127 = vst [vmem:[#allocation76_spill] sm:$0xff] %v2399_v36  ;;  %3128 = vst [vmem:[#allocation77_spill] sm:$0xff] %v2401_v30  ;;  %532 = vmax.xlane.f32.xlu1 %v531_v41 }
 0x24e   :  { %v2403_v18 = vpop.f32.mrf.mxu0  ;;  %v2405_v14 = vpop.f32.mrf.mxu1 }
 0x24f   :  { %3129 = vst [vmem:[#allocation78_spill] sm:$0xff] %v2403_v18  ;;  %3130 = vst [vmem:[#allocation79_spill] sm:$0xff] %v2405_v14 }
 0x250   :  { %v2407_v21 = vpop.f32.mrf.mxu0  ;;  %v2409_v11 = vpop.f32.mrf.mxu1 }
 0x251   :  { %3131 = vst [vmem:[#allocation80_spill] sm:$0xff] %v2407_v21  ;;  %3132 = vst [vmem:[#allocation81_spill] sm:$0xff] %v2409_v11 }
 0x252   :  { %v2411_v23 = vpop.f32.mrf.mxu0  ;;  %v2413_v31 = vpop.f32.mrf.mxu1 }
 0x253   :  { %3133 = vst [vmem:[#allocation82_spill] sm:$0xff] %v2411_v23  ;;  %3134 = vst [vmem:[#allocation83_spill] sm:$0xff] %v2413_v31 }
 0x254   :  { %v2415_v13 = vpop.f32.mrf.mxu0  ;;  %v2417_v35 = vpop.f32.mrf.mxu1 }
 0x255   :  { %3135 = vst [vmem:[#allocation84_spill] sm:$0xff] %v2415_v13  ;;  %3136 = vst [vmem:[#allocation85_spill] sm:$0xff] %v2417_v35 }
 0x256   :  { %v2419_v16 = vpop.f32.mrf.mxu0  ;;  %v2421_v46 = vpop.f32.mrf.mxu1 }
 0x257   :  { %3137 = vst [vmem:[#allocation86_spill] sm:$0xff] %v2419_v16  ;;  %3138 = vst [vmem:[#allocation87_spill] sm:$0xff] %v2421_v46  ;;  %v1333_v41 = vmax.f32 %v2415_v13, %v2419_v16  ;;  %v1327_v13 = vmax.f32 %v2399_v36, %v2403_v18 }
 0x258   :  { %v2425_v44 = vpop.f32.mrf.mxu0  ;;  %v2427_v20 = vpop.f32.mrf.mxu1 }
 0x259   :  { %3139 = vst [vmem:[#allocation88_spill] sm:$0xff] %v2425_v44  ;;  %3140 = vst [vmem:[#allocation89_spill] sm:$0xff] %v2427_v20  ;;  %1334 = vmax.xlane.f32.xlu1 %v1333_v41 }
 0x25a   :  { %v2429_v34 = vpop.f32.mrf.mxu0  ;;  %v2431_v48 = vpop.f32.mrf.mxu1 }
 0x25b   :  { %3141 = vst [vmem:[#allocation90_spill] sm:$0xff] %v2429_v34  ;;  %3142 = vst [vmem:[#allocation91_spill] sm:$0xff] %v2431_v48 }
 0x25c   :  { %v2435_v11 = vpop.f32.mrf.mxu0  ;;  %v2437_v31 = vpop.f32.mrf.mxu1 }
 0x25d   :  { %3143 = vst [vmem:[#allocation92_spill] sm:$0xff] %v2435_v11  ;;  %3144 = vst [vmem:[#allocation93_spill] sm:$0xff] %v2437_v31  ;;  %526 = vmax.xlane.f32.xlu1 %v525_v53  ;;  %v519_v53 = vmax.f32 %v2313_v10, %v2315_v12  ;;  %v513_v10 = vmax.f32 %v2305_v6, %v2307_v7  ;;  %v507_v6 = vmax.f32 %v2297_v3, %v2299_v4 }
 0x25e   :  { %v2439_v40 = vpop.f32.mrf.mxu0  ;;  %v2441_v16 = vpop.f32.mrf.mxu1  ;;  %v501_v3 = vmax.f32 %v2289_v62, %v2291_v63 }
 0x25f   :  { %3145 = vst [vmem:[#allocation94_spill] sm:$0xff] %v2439_v40  ;;  %3146 = vst [vmem:[#allocation95_spill] sm:$0xff] %v2441_v16 }
 0x260   :  { %v2445_v41 = vpop.f32.mrf.mxu0  ;;  %v2447_v52 = vpop.f32.mrf.mxu1 }
 0x261   :  { %3147 = vst [vmem:[#allocation96_spill] sm:$0xff] %v2445_v41  ;;  %3148 = vst [vmem:[#allocation97_spill] sm:$0xff] %v2447_v52  ;;  %1328 = vmax.xlane.f32.xlu1 %v1327_v13 }
 0x262   :  { %v2449_v30 = vpop.f32.mrf.mxu0  ;;  %v2451_v28 = vpop.f32.mrf.mxu1 }
 0x263   :  { %3149 = vst [vmem:[#allocation98_spill] sm:$0xff] %v2449_v30  ;;  %3150 = vst [vmem:[#allocation99_spill] sm:$0xff] %v2451_v28  ;;  %v1342_v26 = vmax.f32 %v2445_v41, %v2449_v30 }
 0x264   :  { %v2457_v14 = vpop.f32.mrf.mxu0  ;;  %v2459_v50 = vpop.f32.mrf.mxu1 }
 0x265   :  { %3151 = vst [vmem:[#allocation100_spill] sm:$0xff] %v2457_v14  ;;  %1343 = vmax.xlane.f32.xlu0 %v1342_v26  ;;  %520 = vmax.xlane.f32.xlu1 %v519_v53  ;;  %v1336_v53 = vmax.f32 %v2425_v44, %v2429_v34 }
 0x266   :  { %v2461_v18 = vpop.f32.mrf.mxu0  ;;  %v2463_v36 = vpop.f32.mrf.mxu1 }
 0x267   :  { %3152 = vst [vmem:[#allocation101_spill] sm:$0xff] %v2461_v18  ;;  %v1345_v13 = vmax.f32 %v2457_v14, %v2461_v18 }
 0x268   :  { %v2469_v30 = vpop.f32.mrf.mxu0  ;;  %v2471_v41 = vpop.f32.mrf.mxu1 }
 0x269   :  { %3153 = vst [vmem:[#allocation102_spill] sm:$0xff] %v2469_v30  ;;  %1346 = vmax.xlane.f32.xlu0 %v1345_v13  ;;  %1322 = vmax.xlane.f32.xlu1 %v1321_v42  ;;  %v1339_v42 = vmax.f32 %v2435_v11, %v2439_v40 }
 0x26a   :  { %v2473_v12 = vpop.f32.mrf.mxu0  ;;  %v2475_v26 = vpop.f32.mrf.mxu1 }
 0x26b   :  { %3154 = vst [vmem:[#allocation103_spill] sm:$0xff] %v2473_v12  ;;  %3155 = vst [vmem:[#allocation104_spill] sm:$0xff] %v2475_v26 }
 0x26c   :  { %v2481_v18 = vpop.f32.mrf.mxu0  ;;  %v2483_v14 = vpop.f32.mrf.mxu1 }
 0x26d   :  { %3156 = vst [vmem:[#allocation105_spill] sm:$0xff] %v2481_v18  ;;  %1337 = vmax.xlane.f32.xlu0 %v1336_v53  ;;  %514 = vmax.xlane.f32.xlu1 %v513_v10  ;;  %v528_v10 = vmax.f32 %v2333_v32, %v2337_v38 }
 0x26e   :  { %v2485_v17 = vpop.f32.mrf.mxu0  ;;  %v2487_v13 = vpop.f32.mrf.mxu1 }
 0x26f   :  { %3157 = vst [vmem:[#allocation106_spill] sm:$0xff] %v2485_v17 }
 0x270   :  { %v2493_v34 = vpop.f32.mrf.mxu0  ;;  %v2495_v44 = vpop.f32.mrf.mxu1 }
 0x271   :  { %3158 = vst [vmem:[#allocation107_spill] sm:$0xff] %v2493_v34  ;;  %1340 = vmax.xlane.f32.xlu0 %v1339_v42  ;;  %1316 = vmax.xlane.f32.xlu1 %v1315_v43  ;;  %v1330_v43 = vmax.f32 %v2407_v21, %v2411_v23 }
 0x272   :  { %v2497_v7 = vpop.f32.mrf.mxu0  ;;  %v2499_v53 = vpop.f32.mrf.mxu1 }
 0x273   :  { %3159 = vst [vmem:[#allocation108_spill] sm:$0xff] %v2497_v7 }
 0x274   :  { %v2505_v40 = vpop.f32.mrf.mxu0  ;;  %v2507_v11 = vpop.f32.mrf.mxu1 }
 0x275   :  { %3160 = vst [vmem:[#allocation109_spill] sm:$0xff] %v2505_v40  ;;  %529 = vmax.xlane.f32.xlu0 %v528_v10  ;;  %508 = vmax.xlane.f32.xlu1 %v507_v6  ;;  %v522_v6 = vmax.f32 %v2317_v15, %v2321_v24 }
 0x276   :  { %v2509_v56 = vpop.f32.mrf.mxu0  ;;  %v2511_v42 = vpop.f32.mrf.mxu1 }
 0x277   :  { %3161 = vst [vmem:[#allocation110_spill] sm:$0xff] %v2509_v56 }
 0x278   :  { %v2517_v38 = vpop.f32.mrf.mxu0  ;;  %v2519_v32 = vpop.f32.mrf.mxu1 }
 0x279   :  { %3162 = vst [vmem:[#allocation111_spill] sm:$0xff] %v2517_v38  ;;  %1331 = vmax.xlane.f32.xlu0 %v1330_v43  ;;  %1310 = vmax.xlane.f32.xlu1 %v1309_v54  ;;  %v1324_v54 = vmax.f32 %v2389_v57, %v2393_v37 }
 0x27a   :  { %v2521_v4 = vpop.f32.mrf.mxu0  ;;  %v2523_v10 = vpop.f32.mrf.mxu1 }
 0x27b   :  { %3163 = vst [vmem:[#allocation112_spill] sm:$0xff] %v2521_v4 }
 0x27c   :  { %v2529_v23 = vpop.f32.mrf.mxu0  ;;  %v2531_v21 = vpop.f32.mrf.mxu1 }
 0x27d   :  { %3164 = vst [vmem:[#allocation113_spill] sm:$0xff] %v2529_v23  ;;  %3165 = vst [vmem:[#allocation114_spill] sm:$0xff] %v2531_v21  ;;  %523 = vmax.xlane.f32.xlu0 %v522_v6  ;;  %502 = vmax.xlane.f32.xlu1 %v501_v3  ;;  %v516_v3 = vmax.f32 %v2309_v8, %v2311_v9 }
 0x27e   :  { %v2533_v47 = vpop.f32.mrf.mxu0  ;;  %v2535_v43 = vpop.f32.mrf.mxu1 }
 0x27f   :  { %3166 = vst [vmem:[#allocation115_spill] sm:$0xff] %v2533_v47  ;;  %3167 = vst [vmem:[#allocation116_spill] sm:$0xff] %v2535_v43  ;;  %v585_v63 = vmax.f32 %v2531_v21, %v2535_v43 }
 0x280   :  { %v2541_v24 = vpop.f32.mrf.mxu0  ;;  %v2575_v9 = vpop.f32.mrf.mxu1 }
 0x281   :  { %3168 = vst [vmem:[#allocation117_spill] sm:$0xff] %v2541_v24  ;;  %1325 = vmax.xlane.f32.xlu0 %v1324_v54  ;;  %1304 = vmax.xlane.f32.xlu1 %v1303_v45  ;;  %v510_v54 = vmax.f32 %v2301_v0, %v2303_v5 }
 0x282   :  { %v2545_v62 = vpop.f32.mrf.mxu0  ;;  %v2581_v0 = vpop.f32.mrf.mxu1 }
 0x283   :  { %3169 = vst [vmem:[#allocation118_spill] sm:$0xff] %v2545_v62 }
 0x284   :  { %v2549_v6 = vpop.f32.mrf.mxu0 }
 0x285   :  { %3170 = vst [vmem:[#allocation119_spill] sm:$0xff] %v2549_v6  ;;  %517 = vmax.xlane.f32.xlu0 %v516_v3  ;;  %586 = vmax.xlane.f32.xlu1 %v585_v63  ;;  %v1312_v63 = vmax.f32 %v2351_v49, %v2355_v51 }
 0x286   :  { %v2551_v37 = vpop.f32.mrf.mxu0 }
 0x287   :  { %3171 = vst [vmem:[#allocation120_spill] sm:$0xff] %v2551_v37 }
 0x288   :  { %v2555_v27 = vpop.f32.mrf.mxu0 }
 0x289   :  { %3172 = vst [vmem:[#allocation121_spill] sm:$0xff] %v2555_v27  ;;  %1319 = vmax.xlane.f32.xlu0 %v1318_v29  ;;  %v504_v29 = vmax.f32 %v2293_v1, %v2295_v2  ;;  %v498_v2 = vmax.f32 %v2285_v60, %v2287_v61  ;;  %v2589_v1 = vpop.f32.mrf.mxu1  ;;  %v588_v60 = vmax.f32 %v2575_v9, %v2581_v0 }
 0x28a   :  { %v2557_v45 = vpop.f32.mrf.mxu0 }
 0x28b   :  { %3173 = vst [vmem:[#allocation122_spill] sm:$0xff] %v2557_v45  ;;  %v2599_v8 = vpop.f32.mrf.mxu1 }
 0x28c   :  { %v2561_v43 = vpop.f32.mrf.mxu0  ;;  %3175 = vst [vmem:[#allocation124_spill] sm:$0xff] %v2599_v8 }
 0x28d   :  { %511 = vmax.xlane.f32.xlu0 %v510_v54  ;;  %v1306_v54 = vmax.f32 %v2335_v33, %v2339_v39  ;;  %v1300_v39 = vmax.f32 %v2319_v19, %v2323_v25 }
 0x28e   :  { %v2563_v21 = vpop.f32.mrf.mxu0 }
 0x290   :  { %v2567_v3 = vpop.f32.mrf.mxu0 }
 0x291   :  { %1313 = vmax.xlane.f32.xlu0 %v1312_v63 }
 0x292   :  { %v2569_v22 = vpop.f32.mrf.mxu0 }
 0x294   :  { %v2573_v59 = vpop.f32.mrf.mxu0 }
 0x295   :  { %505 = vmax.xlane.f32.xlu0 %v504_v29 }
 0x296   :  { %v2577_v5 = vpop.f32.mrf.mxu0 }
 0x298   :  { %v2583_v51 = vpop.f32.mrf.mxu0 }
 0x299   :  { %1307 = vmax.xlane.f32.xlu0 %v1306_v54 }
 0x29a   :  { %v2585_v63 = vpop.f32.mrf.mxu0 }
 0x29c   :  { %v2591_v49 = vpop.f32.mrf.mxu0 }
 0x29d   :  { %499 = vmax.xlane.f32.xlu0 %v498_v2  ;;  %v591_v2 = vmax.f32 %v2589_v1, %v2599_v8  ;;  %v579_v8 = vmax.f32 %v2507_v11, %v2511_v42 }
 0x29e   :  { %v2593_v29 = vpop.f32.mrf.mxu0 }
 0x29f   :  { %3174 = vst [vmem:[#allocation123_spill] sm:$0xff] %v2593_v29  ;;  %v1387_v33 = vmax.f32 %v2591_v49, %v2593_v29 }
 0x2a0   :  { %v2601_v54 = vpop.f32.mrf.mxu0 }
 0x2a1   :  { %1301 = vmax.xlane.f32.xlu0 %v1300_v39  ;;  %1388 = vmax.xlane.f32.xlu1 %v1387_v33  ;;  %v582_v39 = vmax.f32 %v2519_v32, %v2523_v10 }
 0x2a2   :  { %v2603_v61 = vpop.f32.mrf.mxu0 }
 0x2a3   :  { %v1390_v29 = vmax.f32 %v2601_v54, %v2603_v61 }
 0x2a4   :  { %v2609_v57 = vpop.f32.mrf.mxu0 }
 0x2a5   :  { %589 = vmax.xlane.f32.xlu0 %v588_v60  ;;  %592 = vmax.xlane.f32.xlu1 %v591_v2  ;;  %v1384_v60 = vmax.f32 %v2583_v51, %v2585_v63  ;;  %v1381_v2 = vmax.f32 %v2573_v59, %v2577_v5 }
 0x2a6   :  { %v2611_v25 = vpop.f32.mrf.mxu0 }
 0x2a7   :  { %v1393_v33 = vmax.f32 %v2609_v57, %v2611_v25 }
 0x2a9   :  { %1391 = vmax.xlane.f32.xlu0 %v1390_v29  ;;  %1394 = vmax.xlane.f32.xlu1 %v1393_v33  ;;  %v576_v29 = vmax.f32 %v2495_v44, %v2499_v53  ;;  %v573_v33 = vmax.f32 %v2483_v14, %v2487_v13 }
 0x2ad   :  { %583 = vmax.xlane.f32.xlu0 %v582_v39  ;;  %580 = vmax.xlane.f32.xlu1 %v579_v8  ;;  %v1378_v39 = vmax.f32 %v2567_v3, %v2569_v22  ;;  %v1375_v8 = vmax.f32 %v2561_v43, %v2563_v21 }
 0x2b1   :  { %1385 = vmax.xlane.f32.xlu0 %v1384_v60  ;;  %1382 = vmax.xlane.f32.xlu1 %v1381_v2  ;;  %v570_v60 = vmax.f32 %v2471_v41, %v2475_v26  ;;  %v567_v2 = vmax.f32 %v2459_v50, %v2463_v36 }
 0x2b5   :  { %577 = vmax.xlane.f32.xlu0 %v576_v29  ;;  %574 = vmax.xlane.f32.xlu1 %v573_v33  ;;  %v1372_v29 = vmax.f32 %v2555_v27, %v2557_v45  ;;  %v1369_v33 = vmax.f32 %v2549_v6, %v2551_v37 }
 0x2b9   :  { %1379 = vmax.xlane.f32.xlu0 %v1378_v39  ;;  %1376 = vmax.xlane.f32.xlu1 %v1375_v8  ;;  %v564_v39 = vmax.f32 %v2447_v52, %v2451_v28  ;;  %v561_v8 = vmax.f32 %v2437_v31, %v2441_v16  ;;  %v3180_v31 = vld [vmem:[#allocation68_spill] sm:$0xff]  ;;  %v3182_v28 = vld [vmem:[#allocation83_spill] sm:$0xff] }
 0x2bd   :  { %571 = vmax.xlane.f32.xlu0 %v570_v60  ;;  %568 = vmax.xlane.f32.xlu1 %v567_v2  ;;  %v1366_v60 = vmax.f32 %v2541_v24, %v2545_v62  ;;  %v1363_v2 = vmax.f32 %v2529_v23, %v2533_v47  ;;  %v3176_v47 = vld [vmem:[#allocation66_spill] sm:$0xff] }
 0x2c1   :  { %1373 = vmax.xlane.f32.xlu0 %v1372_v29  ;;  %1370 = vmax.xlane.f32.xlu1 %v1369_v33  ;;  %v555_v29 = vmax.f32 %v2417_v35, %v2421_v46  ;;  %v558_v33 = vmax.f32 %v2427_v20, %v2431_v48  ;;  %v3177_v35 = vld [vmem:[#allocation60_spill] sm:$0xff]  ;;  %v3179_v20 = vld [vmem:[#allocation77_spill] sm:$0xff] }
 0x2c5   :  { %565 = vmax.xlane.f32.xlu0 %v564_v39  ;;  %562 = vmax.xlane.f32.xlu1 %v561_v8  ;;  %v1357_v8 = vmax.f32 %v2505_v40, %v2509_v56  ;;  %v3181_v40 = vld [vmem:[#allocation70_spill] sm:$0xff] }
 0x2c6   :  { %v536_v26 = vpop.xlane.xlu0 %535 }
 0x2c7   :  { %v619_v48 = vsub.f32 %v3177_v35, %v536_v26  ;;  %v1351_v35 = vmax.f32 %v2481_v18, %v2485_v17 }
 0x2c9   :  { %1367 = vmax.xlane.f32.xlu0 %v1366_v60  ;;  %1364 = vmax.xlane.f32.xlu1 %v1363_v2  ;;  %v1360_v2 = vmax.f32 %v2517_v38, %v2521_v4 }
 0x2ca   :  { %v539_v37 = vpop.xlane.xlu0 %538 }
 0x2cb   :  { %v621_v16 = vsub.f32 %v2363_v55, %v539_v37 }
 0x2cd   :  { %559 = vmax.xlane.f32.xlu0 %v558_v33  ;;  %556 = vmax.xlane.f32.xlu1 %v555_v29  ;;  %v712_v23 = vmul.f32 1.442695, %v621_v16  ;;  %v3178_v29 = vld [vmem:[#allocation79_spill] sm:$0xff] }
 0x2ce   :  { %v542_v39 = vpop.xlane.xlu0 %541  ;;  %v549_v24 = vmax.f32 %v3179_v20, %v3178_v29  ;;  %v42_v20 = vld [vmem:[%s2960_s2 + $0x28] sm:$0xff] }
 0x2cf   :  { %v622_v62 = vsub.f32 %v2369_v58, %v542_v39  ;;  %v623_v60 = vsub.f32 %v3176_v47, %v542_v39  ;;  %v3183_v47 = vld [vmem:[#allocation81_spill] sm:$0xff]  ;;  %1790 = vpow2.f32 %v712_v23 }
 0x2d0   :  { %v552_v39 = vmax.f32 %v3183_v47, %v3182_v28 }
 0x2d1   :  { %v714_v46 = vmul.f32 1.442695, %v622_v62  ;;  %1361 = vmax.xlane.f32.xlu0 %v1360_v2  ;;  %1358 = vmax.xlane.f32.xlu1 %v1357_v8  ;;  %v716_v55 = vmul.f32 1.442695, %v623_v60  ;;  %v708_v8 = vmul.f32 1.442695, %v619_v48 }
 0x2d2   :  { %v545_v33 = vpop.xlane.xlu1 %544  ;;  %v3184_v60 = vld [vmem:[#allocation62_spill] sm:$0xff] }
 0x2d3   :  { %v624_v56 = vsub.f32 %v3180_v31, %v545_v33  ;;  %v625_v58 = vsub.f32 %v3181_v40, %v545_v33  ;;  %1792 = vpow2.f32 %v714_v46  ;;  %v620_v2 = vsub.f32 %v3184_v60, %v539_v37  ;;  %v3185_v40 = vld [vmem:[#allocation58_spill] sm:$0xff] }
 0x2d4   :  { %1794 = vpow2.f32 %v716_v55  ;;  %v1354_v31 = vmax.f32 %v2493_v34, %v2497_v7  ;;  %v618_v33 = vsub.f32 %v3185_v40, %v536_v26  ;;  %v1348_v37 = vmax.f32 %v2469_v30, %v2473_v12  ;;  %v3188_v60 = vld [vmem:[#allocation54_spill] sm:$0xff] }
 0x2d5   :  { %v718_v16 = vmul.f32 1.442695, %v624_v56  ;;  %v720_v62 = vmul.f32 1.442695, %v625_v58  ;;  %553 = vmax.xlane.f32.xlu0 %v552_v39  ;;  %550 = vmax.xlane.f32.xlu1 %v549_v24  ;;  %v710_v46 = vmul.f32 1.442695, %v620_v2 }
 0x2d6   :  { %v3186_v56 = vld [vmem:[#allocation75_spill] sm:$0xff]  ;;  %v3187_v24 = vld [vmem:[#allocation73_spill] sm:$0xff]  ;;  %v706_v23 = vmul.f32 1.442695, %v618_v33  ;;  %v533_v55 = vpop.xlane.xlu1 %532 }
 0x2d7   :  { %1796 = vpow2.f32 %v718_v16  ;;  %v546_v48 = vmax.f32 %v3187_v24, %v3186_v56  ;;  %v616_v2 = vsub.f32 %v3188_v60, %v533_v55  ;;  %v3191_v56 = vld [vmem:[#allocation86_spill] sm:$0xff] }
 0x2d8   :  { %1798 = vpow2.f32 %v720_v62 }
 0x2d9   :  { %1355 = vmax.xlane.f32.xlu0 %v1354_v31  ;;  %1352 = vmax.xlane.f32.xlu1 %v1351_v35  ;;  %1800 = vpow2.f32 %v708_v8  ;;  %v702_v18 = vmul.f32 1.442695, %v616_v2 }
 0x2da   :  { %1802 = vpow2.f32 %v710_v46  ;;  %v40_v46 = vld [vmem:[%s2960_s2 + $0x18] sm:$0xff] }
 0x2db   :  { %1804 = vpow2.f32 %v706_v23 }
 0x2dc   :  { %v1791_v58 = vpop.eup %1790  ;;  %1806 = vpow2.f32 %v702_v18 }
 0x2dd   :  { %547 = vmax.xlane.f32.xlu0 %v546_v48  ;;  %v3189_v48 = vld [vmem:[#allocation56_spill] sm:$0xff] }
 0x2de   :  { %v617_v12 = vsub.f32 %v3189_v48, %v533_v55  ;;  %v3193_v55 = vld [vmem:[#allocation48_spill] sm:$0xff] }
 0x2e0   :  { %v1793_v39 = vpop.eup %1792  ;;  %v704_v17 = vmul.f32 1.442695, %v617_v12 }
 0x2e1   :  { %1349 = vmax.xlane.f32.xlu0 %v1348_v37  ;;  %v1795_v26 = vpop.eup %1794  ;;  %v3190_v37 = vld [vmem:[#allocation84_spill] sm:$0xff] }
 0x2e2   :  { %v1335_v16 = vpop.xlane.xlu1 %1334  ;;  %1808 = vpow2.f32 %v704_v17  ;;  %v3201_v17 = vld [vmem:[#allocation43_spill] sm:$0xff] }
 0x2e3   :  { %v1418_v30 = vsub.f32 %v3190_v37, %v1335_v16  ;;  %v1419_v24 = vsub.f32 %v3191_v56, %v1335_v16  ;;  %v3194_v16 = vld [vmem:[#allocation96_spill] sm:$0xff] }
 0x2e4   :  { %v1797_v62 = vpop.eup %1796 }
 0x2e5   :  { %v1799_v35 = vpop.eup %1798  ;;  %v800_v8 = vpack.c.bf16 %v1797_v62, %v1793_v39  ;;  %v3192_v62 = vld [vmem:[#allocation46_spill] sm:$0xff] }
 0x2e6   :  { %v527_v31 = vpop.xlane.xlu1 %526  ;;  %v801_v40 = vpack.c.bf16 %v1799_v35, %v1795_v26  ;;  %v1801_v33 = vpop.eup %1800  ;;  %v41_v35 = vld [vmem:[%s2960_s2 + $0x20] sm:$0xff] }
 0x2e7   :  { %v799_v23 = vpack.c.bf16 %v1791_v58, %v1801_v33  ;;  %v612_v26 = vsub.f32 %v3192_v62, %v527_v31  ;;  %v1803_v60 = vpop.eup %1802  ;;  %v1504_v58 = vmul.f32 1.442695, %v1418_v30  ;;  %v3196_v30 = vld [vmem:[#allocation76_spill] sm:$0xff] }
 0x2e8   :  { %818 = vmatprep.subr.bf16.mxu1 %v801_v40  ;;  %v613_v40 = vsub.f32 %v3193_v55, %v527_v31  ;;  %v1805_v33 = vpop.eup %1804 }
 0x2e9   :  { %819 = vmatpush1.bf16.xpose.msra.mxu1 %v800_v8  ;;  %v1506_v8 = vmul.f32 1.442695, %v1419_v24  ;;  %v694_v56 = vmul.f32 1.442695, %v612_v26  ;;  %v798_v62 = vpack.c.bf16 %v1803_v60, %v1805_v33  ;;  %1810 = vpow2.f32 %v1504_v58  ;;  %v3197_v24 = vld [vmem:[#allocation78_spill] sm:$0xff]  ;;  %v3199_v33 = vld [vmem:[#allocation100_spill] sm:$0xff] }
 0x2ea   :  { %820 = vmatprep.subr.bf16.mxu1 %v799_v23  ;;  %v1329_v39 = vpop.xlane.xlu1 %1328  ;;  %73 = vperm.xlu1 %1785, %v40_v46   ;;  %v3195_v46 = vld [vmem:[#allocation98_spill] sm:$0xff]  ;;  %v696_v12 = vmul.f32 1.442695, %v613_v40 }
 0x2eb   :  { %v1414_v31 = vsub.f32 %v3196_v30, %v1329_v39  ;;  %1812 = vpow2.f32 %v1506_v8  ;;  %v1415_v26 = vsub.f32 %v3197_v24, %v1329_v39  ;;  %v39_v58 = vld [vmem:[%s2960_s2 + $0x10] sm:$0xff]  ;;  %v3202_v30 = vld [vmem:[#allocation88_spill] sm:$0xff] }
 0x2ec   :  { %1814 = vpow2.f32 %v694_v56 }
 0x2ed   :  { %1816 = vpow2.f32 %v696_v12  ;;  %v1496_v8 = vmul.f32 1.442695, %v1414_v31  ;;  %v43_v31 = vld [vmem:[%s2960_s2 + $0x30] sm:$0xff]  ;;  %s2118_s2 = smov [#allocation5]  }
 0x2ee   :  { %v1344_v2 = vpop.xlane.xlu0 %1343  ;;  %78 = vperm.xlu1 %1785, %v41_v35   ;;  %v521_v37 = vpop.xlane.xlu1 %520  ;;  %s1721_s12 = sshll.u32 %s2118_s2, 4  ;;  %s1722_s12 = int_to_ptr.vmem [resolvable:$true] %s1721_s12 }
 0x2ef   :  { %v1424_v48 = vsub.f32 %v3194_v16, %v1344_v2  ;;  %v1425_v23 = vsub.f32 %v3195_v46, %v1344_v2  ;;  %v3198_v2 = vld [vmem:[#allocation42_spill] sm:$0xff]  ;;  %v3200_v46 = vld [vmem:[#allocation101_spill] sm:$0xff]  ;;  %v609_v40 = vsub.f32 %v3201_v17, %v521_v37  ;;  %s2090_s13 = scalar_lea.vmem %s1722_s12, 2048  ;;  %p2095_p6 = scmp.lt.s32.totalorder %s1722_s12, %s1722_s12 }
 0x2f0   :  { %v608_v60 = vsub.f32 %v3198_v2, %v521_v37  ;;  %v3206_v17 = vld [vmem:[#allocation94_spill] sm:$0xff]  ;;  %p2091_p5 = scmp.ne.s32.totalorder %s1722_s12, %s2090_s13  ;;  %p2096_p7 = scmp.lt.s32.totalorder %s2090_s13, %s2090_s13 }
 0x2f1   :  { %v1516_v18 = vmul.f32 1.442695, %v1424_v48  ;;  %821 = vmatpush1.bf16.xpose.msra.mxu1 %v798_v62  ;;  %v1518_v35 = vmul.f32 1.442695, %v1425_v23  ;;  %v688_v37 = vmul.f32 1.442695, %v609_v40 }
 0x2f2   :  { %v1347_v55 = vpop.xlane.xlu0 %1346  ;;  %83 = vperm.xlu1 %1785, %v42_v20   ;;  %v1323_v23 = vpop.xlane.xlu1 %1322  ;;  %v1498_v20 = vmul.f32 1.442695, %v1415_v26  ;;  %v686_v62 = vmul.f32 1.442695, %v608_v60  ;;  %p2097_p8 = por %p2096_p7, %p2095_p6 }
 0x2f3   :  { %v1426_v16 = vsub.f32 %v3199_v33, %v1347_v55  ;;  %v1427_v7 = vsub.f32 %v3200_v46, %v1347_v55  ;;  %1818 = vpow2.f32 %v1516_v18  ;;  %v3203_v55 = vld [vmem:[#allocation90_spill] sm:$0xff]  ;;  %v2709_v60 = vpop.eup %1806 }
 0x2f4   :  { %1820 = vpow2.f32 %v1518_v35  ;;  %p2098_p9 = pnand %p2097_p8, %p2091_p5 }
 0x2f5   :  { %v1520_v39 = vmul.f32 1.442695, %v1426_v16  ;;  %v1522_v48 = vmul.f32 1.442695, %v1427_v7  ;;  %v3204_v7 = vld [vmem:[#allocation69_spill] sm:$0xff]  ;;  %v3205_v16 = vld [vmem:[#allocation92_spill] sm:$0xff] }
 0x2f6   :  { %v1338_v56 = vpop.xlane.xlu0 %1337  ;;  %v1410_v26 = vsub.f32 %v3204_v7, %v1323_v23  ;;  %v515_v33 = vpop.xlane.xlu1 %514  ;;  %v3209_v7 = vld [vmem:[#allocation52_spill] sm:$0xff] }
 0x2f7   :  { %1822 = vpow2.f32 %v1520_v39  ;;  %v1420_v24 = vsub.f32 %v3202_v30, %v1338_v56  ;;  %v1421_v12 = vsub.f32 %v3203_v55, %v1338_v56  ;;  %68 = vperm.xlu0 %1784, %v39_v58   ;;  %v2713_v58 = vpop.eup %1808  ;;  %v3207_v39 = vld [vmem:[#allocation71_spill] sm:$0xff]  ;;  %v3208_v55 = vld [vmem:[#allocation50_spill] sm:$0xff] }
 0x2f8   :  { %1824 = vpow2.f32 %v1522_v48  ;;  %v2716_v56 = vpop.eup %1810  ;;  %v1488_v30 = vmul.f32 1.442695, %v1410_v26 }
 0x2f9   :  { %1826 = vpow2.f32 %v1496_v8  ;;  %v1508_v18 = vmul.f32 1.442695, %v1420_v24  ;;  %v1510_v35 = vmul.f32 1.442695, %v1421_v12  ;;  %v1411_v8 = vsub.f32 %v3207_v39, %v1323_v23 }
 0x2fa   :  { %1828 = vpow2.f32 %v1498_v20  ;;  %v1341_v2 = vpop.xlane.xlu0 %1340 }
 0x2fb   :  { %1830 = vpow2.f32 %v686_v62  ;;  %v1422_v46 = vsub.f32 %v3205_v16, %v1341_v2  ;;  %v1423_v40 = vsub.f32 %v3206_v17, %v1341_v2  ;;  %88 = vperm.xlu0 %1784, %v43_v31   ;;  %v2718_v62 = vpop.eup %1812  ;;  %v1490_v23 = vmul.f32 1.442695, %v1411_v8 }
 0x2fc   :  { %1832 = vpow2.f32 %v688_v37  ;;  %v2722_v37 = vpop.eup %1814 }
 0x2fd   :  { %1834 = vpow2.f32 %v1508_v18  ;;  %v1512_v48 = vmul.f32 1.442695, %v1422_v46  ;;  %v1514_v20 = vmul.f32 1.442695, %v1423_v40  ;;  %v2724_v2 = vpop.eup %1816  ;;  %v3210_v18 = vld [vmem:[#allocation38_spill] sm:$0xff]  ;;  %v1317_v46 = vpop.xlane.xlu1 %1316  ;;  %v3211_v40 = vld [vmem:[#allocation39_spill] sm:$0xff] }
 0x2fe   :  { %1836 = vpow2.f32 %v1510_v35  ;;  %v530_v24 = vpop.xlane.xlu0 %529  ;;  %v604_v16 = vsub.f32 %v3210_v18, %v515_v33  ;;  %v605_v39 = vsub.f32 %v3211_v40, %v515_v33 }
 0x2ff   :  { %1838 = vpow2.f32 %v1512_v48  ;;  %v614_v12 = vsub.f32 %v3208_v55, %v530_v24  ;;  %v615_v31 = vsub.f32 %v3209_v7, %v530_v24  ;;  %v3212_v55 = vld [vmem:[#allocation80_spill] sm:$0xff]  ;;  %v3213_v7 = vld [vmem:[#allocation82_spill] sm:$0xff] }
 0x300   :  { %1840 = vpow2.f32 %v1514_v20  ;;  %v1819_v35 = vpop.eup %1818  ;;  %v678_v8 = vmul.f32 1.442695, %v604_v16  ;;  %v3216_v16 = vld [vmem:[#allocation64_spill] sm:$0xff] }
 0x301   :  { %v698_v17 = vmul.f32 1.442695, %v614_v12  ;;  %v700_v26 = vmul.f32 1.442695, %v615_v31  ;;  %1842 = vpow2.f32 %v1488_v30  ;;  %v1821_v34 = vpop.eup %1820  ;;  %v680_v31 = vmul.f32 1.442695, %v605_v39 }
 0x302   :  { %v1332_v48 = vpop.xlane.xlu0 %1331  ;;  %v3214_v30 = vld [vmem:[#allocation63_spill] sm:$0xff]  ;;  %v1407_v39 = vsub.f32 %v3216_v16, %v1317_v46 }
 0x303   :  { %1844 = vpow2.f32 %v698_v17  ;;  %v1416_v24 = vsub.f32 %v3212_v55, %v1332_v48  ;;  %v1417_v29 = vsub.f32 %v3213_v7, %v1332_v48  ;;  %v1406_v4 = vsub.f32 %v3214_v30, %v1317_v46  ;;  %v509_v55 = vpop.xlane.xlu1 %508 }
 0x304   :  { %v1823_v20 = vpop.eup %1822  ;;  %1846 = vpow2.f32 %v700_v26  ;;  %v3215_v26 = vld [vmem:[#allocation44_spill] sm:$0xff]  ;;  %v1482_v52 = vmul.f32 1.442695, %v1407_v39 }
 0x305   :  { %v1825_v28 = vpop.eup %1824  ;;  %1848 = vpow2.f32 %v1490_v23  ;;  %v1500_v18 = vmul.f32 1.442695, %v1416_v24  ;;  %v1502_v47 = vmul.f32 1.442695, %v1417_v29  ;;  %v1602_v38 = vpack.c.bf16 %v1823_v20, %v1819_v35 }
 0x306   :  { %v2730_v12 = vpop.eup %1826  ;;  %v524_v33 = vpop.xlane.xlu0 %523  ;;  %v1603_v40 = vpack.c.bf16 %v1825_v28, %v1821_v34  ;;  %v1480_v35 = vmul.f32 1.442695, %v1406_v4 }
 0x307   :  { %v2733_v17 = vpop.eup %1828  ;;  %1850 = vpow2.f32 %v1500_v18  ;;  %v610_v48 = vsub.f32 %v2317_v15, %v524_v33  ;;  %v611_v7 = vsub.f32 %v3215_v26, %v524_v33  ;;  %v3217_v15 = vld [vmem:[#allocation72_spill] sm:$0xff]  ;;  %v3218_v33 = vld [vmem:[#allocation74_spill] sm:$0xff]  ;;  %v1311_v46 = vpop.xlane.xlu1 %1310 }
 0x308   :  { %v2737_v23 = vpop.eup %1830  ;;  %1852 = vpow2.f32 %v1502_v47  ;;  %1620 = vmatprep.subr.bf16.mxu0 %v1603_v40 }
 0x309   :  { %v2739_v29 = vpop.eup %1832  ;;  %1854 = vpow2.f32 %v678_v8  ;;  %v690_v24 = vmul.f32 1.442695, %v610_v48  ;;  %v692_v34 = vmul.f32 1.442695, %v611_v7  ;;  %1621 = vmatpush1.bf16.xpose.msra.mxu0 %v1602_v38  ;;  %v3219_v8 = vld [vmem:[#allocation34_spill] sm:$0xff]  ;;  %v3220_v38 = vld [vmem:[#allocation35_spill] sm:$0xff] }
 0x30a   :  { %v1835_v28 = vpop.eup %1834  ;;  %1856 = vpow2.f32 %v680_v31  ;;  %v1326_v20 = vpop.xlane.xlu0 %1325  ;;  %v600_v6 = vsub.f32 %v3219_v8, %v509_v55  ;;  %v601_v31 = vsub.f32 %v3220_v38, %v509_v55 }
 0x30b   :  { %v1837_v18 = vpop.eup %1836  ;;  %1858 = vpow2.f32 %v690_v24  ;;  %v1412_v30 = vsub.f32 %v3217_v15, %v1326_v20  ;;  %v1413_v26 = vsub.f32 %v3218_v33, %v1326_v20  ;;  %v3221_v15 = vld [vmem:[#allocation40_spill] sm:$0xff]  ;;  %v3222_v33 = vld [vmem:[#allocation41_spill] sm:$0xff]  ;;  %v503_v38 = vpop.xlane.xlu1 %502 }
 0x30c   :  { %v1839_v47 = vpop.eup %1838  ;;  %1860 = vpow2.f32 %v692_v34 }
 0x30d   :  { %v1841_v40 = vpop.eup %1840  ;;  %v1492_v48 = vmul.f32 1.442695, %v1412_v30  ;;  %v1494_v7 = vmul.f32 1.442695, %v1413_v26  ;;  %1862 = vpow2.f32 %v1480_v35  ;;  %v1600_v45 = vpack.c.bf16 %v1839_v47, %v1835_v28  ;;  %v3223_v28 = vld [vmem:[#allocation55_spill] sm:$0xff] }
 0x30e   :  { %v518_v4 = vpop.xlane.xlu0 %517  ;;  %v1601_v16 = vpack.c.bf16 %v1841_v40, %v1837_v18  ;;  %v2746_v24 = vpop.eup %1842  ;;  %v670_v30 = vmul.f32 1.442695, %v600_v6  ;;  %v672_v18 = vmul.f32 1.442695, %v601_v31  ;;  %v1402_v47 = vsub.f32 %v3223_v28, %v1311_v46 }
 0x30f   :  { %1864 = vpow2.f32 %v1492_v48  ;;  %v606_v20 = vsub.f32 %v3221_v15, %v518_v4  ;;  %v607_v34 = vsub.f32 %v3222_v33, %v518_v4 }
 0x310   :  { %v1845_v27 = vpop.eup %1844  ;;  %1866 = vpow2.f32 %v1494_v7  ;;  %1622 = vmatprep.subr.bf16.mxu0 %v1601_v16  ;;  %v3224_v7 = vld [vmem:[#allocation65_spill] sm:$0xff]  ;;  %v3225_v16 = vld [vmem:[#allocation67_spill] sm:$0xff] }
 0x311   :  { %v1847_v39 = vpop.eup %1846  ;;  %1868 = vpow2.f32 %v1482_v52  ;;  %v682_v26 = vmul.f32 1.442695, %v606_v20  ;;  %v684_v35 = vmul.f32 1.442695, %v607_v34  ;;  %1623 = vmatpush1.bf16.xpose.msra.mxu0 %v1600_v45  ;;  %v796_v48 = vpack.c.bf16 %v2709_v60, %v1845_v27  ;;  %v3226_v27 = vld [vmem:[#allocation57_spill] sm:$0xff] }
 0x312   :  { %v2750_v55 = vpop.eup %1848  ;;  %v1320_v40 = vpop.xlane.xlu0 %1319  ;;  %v797_v8 = vpack.c.bf16 %v2713_v58, %v1847_v39  ;;  %v1403_v60 = vsub.f32 %v3226_v27, %v1311_v46  ;;  %v1472_v58 = vmul.f32 1.442695, %v1402_v47 }
 0x313   :  { %1870 = vpow2.f32 %v682_v26  ;;  %v1408_v4 = vsub.f32 %v3224_v7, %v1320_v40  ;;  %v1409_v52 = vsub.f32 %v3225_v16, %v1320_v40  ;;  %v3230_v16 = vld [vmem:[#allocation31_spill] sm:$0xff] }
 0x314   :  { %v1851_v6 = vpop.eup %1850  ;;  %1872 = vpow2.f32 %v684_v35  ;;  %822 = vmatprep.subr.bf16.mxu1 %v797_v8  ;;  %v3227_v35 = vld [vmem:[#allocation36_spill] sm:$0xff] }
 0x315   :  { %v1853_v45 = vpop.eup %1852  ;;  %1874 = vpow2.f32 %v670_v30  ;;  %v1484_v15 = vmul.f32 1.442695, %v1408_v4  ;;  %v1486_v31 = vmul.f32 1.442695, %v1409_v52  ;;  %823 = vmatpush1.bf16.xpose.msra.mxu1 %v796_v48  ;;  %v1598_v20 = vpack.c.bf16 %v2716_v56, %v1851_v6  ;;  %v3228_v30 = vld [vmem:[#allocation37_spill] sm:$0xff]  ;;  %v3229_v48 = vld [vmem:[#allocation30_spill] sm:$0xff] }
 0x316   :  { %v2758_v33 = vpop.eup %1854  ;;  %1876 = vpow2.f32 %v672_v18  ;;  %v512_v34 = vpop.xlane.xlu0 %511  ;;  %v1599_v39 = vpack.c.bf16 %v2718_v62, %v1853_v45  ;;  %v596_v7 = vsub.f32 %v3229_v48, %v503_v38  ;;  %v1474_v62 = vmul.f32 1.442695, %v1403_v60 }
 0x317   :  { %v2762_v26 = vpop.eup %1856  ;;  %1878 = vpow2.f32 %v1484_v15  ;;  %v602_v28 = vsub.f32 %v3227_v35, %v512_v34  ;;  %v603_v40 = vsub.f32 %v3228_v30, %v512_v34  ;;  %v1305_v18 = vpop.xlane.xlu1 %1304  ;;  %v597_v52 = vsub.f32 %v3230_v16, %v503_v38  ;;  %v3232_v34 = vld [vmem:[#allocation61_spill] sm:$0xff]  ;;  %v3233_v30 = vld [vmem:[#allocation47_spill] sm:$0xff] }
 0x318   :  { %v1859_v8 = vpop.eup %1858  ;;  %1880 = vpow2.f32 %v1486_v31  ;;  %1624 = vmatprep.subr.bf16.mxu0 %v1599_v39  ;;  %v3231_v31 = vld [vmem:[#allocation59_spill] sm:$0xff]  ;;  %v3235_v16 = vld [vmem:[#allocation33_spill] sm:$0xff] }
 0x319   :  { %v1861_v56 = vpop.eup %1860  ;;  %v674_v4 = vmul.f32 1.442695, %v602_v28  ;;  %v676_v46 = vmul.f32 1.442695, %v603_v40  ;;  %1625 = vmatpush1.bf16.xpose.msra.mxu0 %v1598_v20  ;;  %v794_v47 = vpack.c.bf16 %v2722_v37, %v1859_v8  ;;  %1882 = vpow2.f32 %v1472_v58 }
 0x31a   :  { %v1314_v6 = vpop.xlane.xlu0 %1313  ;;  %v795_v45 = vpack.c.bf16 %v2724_v2, %v1861_v56  ;;  %v2770_v15 = vpop.eup %1862  ;;  %v662_v28 = vmul.f32 1.442695, %v596_v7  ;;  %v664_v2 = vmul.f32 1.442695, %v597_v52  ;;  %v1398_v40 = vsub.f32 %v3233_v30, %v1305_v18 }
 0x31b   :  { %1884 = vpow2.f32 %v674_v4  ;;  %v1404_v27 = vsub.f32 %v3231_v31, %v1314_v6  ;;  %v1405_v39 = vsub.f32 %v3232_v34, %v1314_v6  ;;  %v587_v48 = vpop.xlane.xlu1 %586  ;;  %v3234_v4 = vld [vmem:[#allocation32_spill] sm:$0xff]  ;;  %v3237_v34 = vld [vmem:[#allocation114_spill] sm:$0xff] }
 0x31c   :  { %v1865_v35 = vpop.eup %1864  ;;  %1886 = vpow2.f32 %v676_v46  ;;  %824 = vmatprep.subr.bf16.mxu1 %v795_v45  ;;  %v3236_v45 = vld [vmem:[#allocation49_spill] sm:$0xff] }
 0x31d   :  { %v1867_v20 = vpop.eup %1866  ;;  %v1476_v37 = vmul.f32 1.442695, %v1404_v27  ;;  %v1478_v58 = vmul.f32 1.442695, %v1405_v39  ;;  %825 = vmatpush1.bf16.xpose.msra.mxu1 %v794_v47  ;;  %v1596_v38 = vpack.c.bf16 %v2730_v12, %v1865_v35  ;;  %1888 = vpow2.f32 %v1474_v62 }
 0x31e   :  { %v2775_v60 = vpop.eup %1868  ;;  %v506_v8 = vpop.xlane.xlu0 %505  ;;  %v1597_v56 = vpack.c.bf16 %v2733_v17, %v1867_v20  ;;  %v1399_v47 = vsub.f32 %v3236_v45, %v1305_v18  ;;  %v1464_v17 = vmul.f32 1.442695, %v1398_v40  ;;  %v652_v39 = vsub.f32 %v3237_v34, %v587_v48  ;;  %v3238_v18 = vld [vmem:[#allocation51_spill] sm:$0xff]  ;;  %v3241_v45 = vld [vmem:[#allocation28_spill] sm:$0xff] }
 0x31f   :  { %1890 = vpow2.f32 %v1476_v37  ;;  %v598_v46 = vsub.f32 %v3234_v4, %v506_v8  ;;  %v599_v7 = vsub.f32 %v3235_v16, %v506_v8  ;;  %v3240_v4 = vld [vmem:[#allocation116_spill] sm:$0xff] }
 0x320   :  { %v1871_v6 = vpop.eup %1870  ;;  %1892 = vpow2.f32 %v1478_v58  ;;  %1626 = vmatprep.subr.bf16.mxu0 %v1597_v56 }
 0x321   :  { %v1873_v12 = vpop.eup %1872  ;;  %1894 = vpow2.f32 %v662_v28  ;;  %v666_v62 = vmul.f32 1.442695, %v598_v46  ;;  %v668_v52 = vmul.f32 1.442695, %v599_v7  ;;  %1627 = vmatpush1.bf16.xpose.msra.mxu0 %v1596_v38  ;;  %v792_v31 = vpack.c.bf16 %v2737_v23, %v1871_v6  ;;  %v3239_v28 = vld [vmem:[#allocation53_spill] sm:$0xff] }
 0x322   :  { %v2783_v27 = vpop.eup %1874  ;;  %1896 = vpow2.f32 %v664_v2  ;;  %v1308_v35 = vpop.xlane.xlu0 %1307  ;;  %v793_v20 = vpack.c.bf16 %v2739_v29, %v1873_v12  ;;  %v1466_v38 = vmul.f32 1.442695, %v1399_v47  ;;  %v653_v29 = vsub.f32 %v3240_v4, %v587_v48 }
 0x323   :  { %v2787_v37 = vpop.eup %1876  ;;  %1898 = vpow2.f32 %v666_v62  ;;  %v1400_v58 = vsub.f32 %v3238_v18, %v1308_v35  ;;  %v1401_v30 = vsub.f32 %v3239_v28, %v1308_v35  ;;  %v774_v46 = vmul.f32 1.442695, %v652_v39  ;;  %v3242_v62 = vld [vmem:[#allocation29_spill] sm:$0xff] }
 0x324   :  { %v1879_v8 = vpop.eup %1878  ;;  %1900 = vpow2.f32 %v668_v52  ;;  %826 = vmatprep.subr.bf16.mxu1 %v793_v20  ;;  %v776_v34 = vmul.f32 1.442695, %v653_v29 }
 0x325   :  { %v1881_v23 = vpop.eup %1880  ;;  %v1468_v56 = vmul.f32 1.442695, %v1400_v58  ;;  %v1470_v2 = vmul.f32 1.442695, %v1401_v30  ;;  %827 = vmatpush1.bf16.xpose.msra.mxu1 %v792_v31  ;;  %v1594_v40 = vpack.c.bf16 %v2746_v24, %v1879_v8  ;;  %1902 = vpow2.f32 %v1464_v17  ;;  %v3243_v58 = vld [vmem:[#allocation45_spill] sm:$0xff] }
 0x326   :  { %v500_v16 = vpop.xlane.xlu0 %499  ;;  %v1595_v7 = vpack.c.bf16 %v2750_v55, %v1881_v23  ;;  %v2794_v6 = vpop.eup %1882  ;;  %v3244_v23 = vld [vmem:[#allocation123_spill] sm:$0xff] }
 0x327   :  { %1904 = vpow2.f32 %v1468_v56  ;;  %v594_v12 = vsub.f32 %v3241_v45, %v500_v16  ;;  %v595_v52 = vsub.f32 %v3242_v62, %v500_v16 }
 0x328   :  { %v1885_v47 = vpop.eup %1884  ;;  %1906 = vpow2.f32 %v1470_v2  ;;  %1628 = vmatprep.subr.bf16.mxu0 %v1595_v7 }
 0x329   :  { %v1887_v31 = vpop.eup %1886  ;;  %1908 = vpow2.f32 %v1466_v38  ;;  %v658_v24 = vmul.f32 1.442695, %v594_v12  ;;  %v660_v17 = vmul.f32 1.442695, %v595_v52  ;;  %1629 = vmatpush1.bf16.xpose.msra.mxu0 %v1594_v40  ;;  %v790_v48 = vpack.c.bf16 %v2758_v33, %v1885_v47 }
 0x32a   :  { %1910 = vpow2.f32 %v774_v46  ;;  %v1302_v55 = vpop.xlane.xlu0 %1301  ;;  %v1389_v39 = vpop.xlane.xlu1 %1388  ;;  %v791_v35 = vpack.c.bf16 %v2762_v26, %v1887_v31 }
 0x32b   :  { %v2800_v20 = vpop.eup %1888  ;;  %1912 = vpow2.f32 %v658_v24  ;;  %v1396_v18 = vsub.f32 %v2319_v19, %v1302_v55  ;;  %v1397_v28 = vsub.f32 %v3243_v58, %v1302_v55  ;;  %v1454_v30 = vsub.f32 %v2591_v49, %v1389_v39 }
 0x32c   :  { %v1891_v8 = vpop.eup %1890  ;;  %1914 = vpow2.f32 %v660_v17  ;;  %v1455_v38 = vsub.f32 %v3244_v23, %v1389_v39  ;;  %828 = vmatprep.subr.bf16.mxu1 %v791_v35 }
 0x32d   :  { %v1893_v33 = vpop.eup %1892  ;;  %v1460_v56 = vmul.f32 1.442695, %v1396_v18  ;;  %v1462_v2 = vmul.f32 1.442695, %v1397_v28  ;;  %v1576_v40 = vmul.f32 1.442695, %v1454_v30  ;;  %829 = vmatpush1.bf16.xpose.msra.mxu1 %v790_v48  ;;  %v1592_v26 = vpack.c.bf16 %v2770_v15, %v1891_v8 }
 0x32e   :  { %v2807_v4 = vpop.eup %1894  ;;  %1916 = vpow2.f32 %v776_v34  ;;  %v1578_v19 = vmul.f32 1.442695, %v1455_v38  ;;  %v590_v29 = vpop.xlane.xlu0 %589  ;;  %v1593_v49 = vpack.c.bf16 %v2775_v60, %v1893_v33  ;;  %v3245_v15 = vld [vmem:[#allocation124_spill] sm:$0xff] }
 0x32f   :  { %v593_v46 = vpop.xlane.xlu1 %592  ;;  %v2810_v16 = vpop.eup %1896  ;;  %1918 = vpow2.f32 %v1460_v56  ;;  %v654_v7 = vsub.f32 %v2575_v9, %v590_v29  ;;  %v655_v45 = vsub.f32 %v2581_v0, %v590_v29 }
 0x330   :  { %v656_v12 = vsub.f32 %v2589_v1, %v593_v46  ;;  %v1899_v62 = vpop.eup %1898  ;;  %1920 = vpow2.f32 %v1462_v2  ;;  %v657_v52 = vsub.f32 %v3245_v15, %v593_v46  ;;  %1630 = vmatprep.subr.bf16.mxu0 %v1593_v49 }
 0x331   :  { %v1901_v47 = vpop.eup %1900  ;;  %1922 = vpow2.f32 %v1576_v40  ;;  %v778_v31 = vmul.f32 1.442695, %v654_v7  ;;  %v780_v24 = vmul.f32 1.442695, %v655_v45  ;;  %1631 = vmatpush1.bf16.xpose.msra.mxu0 %v1592_v26  ;;  %v788_v0 = vpack.c.bf16 %v2783_v27, %v1899_v62 }
 0x332   :  { %v782_v17 = vmul.f32 1.442695, %v656_v12  ;;  %1924 = vpow2.f32 %v1578_v19  ;;  %v784_v60 = vmul.f32 1.442695, %v657_v52  ;;  %v1392_v48 = vpop.xlane.xlu0 %1391  ;;  %v789_v9 = vpack.c.bf16 %v2787_v37, %v1901_v47  ;;  %v2818_v1 = vpop.eup %1902 }
 0x333   :  { %v1395_v34 = vpop.xlane.xlu1 %1394  ;;  %1926 = vpow2.f32 %v778_v31  ;;  %v1456_v55 = vsub.f32 %v2601_v54, %v1392_v48  ;;  %v1457_v39 = vsub.f32 %v2603_v61, %v1392_v48 }
 0x334   :  { %v1458_v35 = vsub.f32 %v2609_v57, %v1395_v34  ;;  %v1905_v18 = vpop.eup %1904  ;;  %1928 = vpow2.f32 %v780_v24  ;;  %v1459_v58 = vsub.f32 %v2611_v25, %v1395_v34  ;;  %830 = vmatprep.subr.bf16.mxu1 %v789_v9 }
 0x335   :  { %v1907_v28 = vpop.eup %1906  ;;  %1930 = vpow2.f32 %v782_v17  ;;  %v1580_v30 = vmul.f32 1.442695, %v1456_v55  ;;  %v1582_v37 = vmul.f32 1.442695, %v1457_v39  ;;  %831 = vmatpush1.bf16.xpose.msra.mxu1 %v788_v0  ;;  %v1590_v57 = vpack.c.bf16 %v2794_v6, %v1905_v18 }
 0x336   :  { %v1584_v8 = vmul.f32 1.442695, %v1458_v35  ;;  %v1909_v27 = vpop.eup %1908  ;;  %1932 = vpow2.f32 %v784_v60  ;;  %v1586_v23 = vmul.f32 1.442695, %v1459_v58  ;;  %v584_v38 = vpop.xlane.xlu0 %583  ;;  %v1591_v61 = vpack.c.bf16 %v2800_v20, %v1907_v28 }
 0x337   :  { %v581_v54 = vpop.xlane.xlu1 %580  ;;  %v2826_v33 = vpop.eup %1910  ;;  %1934 = vpow2.f32 %v1580_v30  ;;  %v650_v25 = vsub.f32 %v2519_v32, %v584_v38  ;;  %v651_v56 = vsub.f32 %v2523_v10, %v584_v38 }
 0x338   :  { %v648_v2 = vsub.f32 %v2507_v11, %v581_v54  ;;  %v1913_v40 = vpop.eup %1912  ;;  %1936 = vpow2.f32 %v1582_v37  ;;  %v649_v26 = vsub.f32 %v2511_v42, %v581_v54  ;;  %1632 = vmatprep.subr.bf16.mxu0 %v1591_v61 }
 0x339   :  { %v1915_v19 = vpop.eup %1914  ;;  %1938 = vpow2.f32 %v1584_v8  ;;  %v770_v29 = vmul.f32 1.442695, %v650_v25  ;;  %v772_v20 = vmul.f32 1.442695, %v651_v56  ;;  %1633 = vmatpush1.bf16.xpose.msra.mxu0 %v1590_v57  ;;  %v786_v10 = vpack.c.bf16 %v2807_v4, %v1913_v40  ;;  %v3246_v40 = vld [vmem:[#allocation104_spill] sm:$0xff] }
 0x33a   :  { %v766_v46 = vmul.f32 1.442695, %v648_v2  ;;  %1940 = vpow2.f32 %v1586_v23  ;;  %v768_v6 = vmul.f32 1.442695, %v649_v26  ;;  %v1386_v49 = vpop.xlane.xlu0 %1385  ;;  %v787_v32 = vpack.c.bf16 %v2810_v16, %v1915_v19 }
 0x33b   :  { %v1383_v7 = vpop.xlane.xlu1 %1382  ;;  %v2834_v11 = vpop.eup %1916  ;;  %1942 = vpow2.f32 %v770_v29  ;;  %v1452_v42 = vsub.f32 %v2583_v51, %v1386_v49  ;;  %v1453_v45 = vsub.f32 %v2585_v63, %v1386_v49 }
 0x33c   :  { %v1450_v12 = vsub.f32 %v2573_v59, %v1383_v7  ;;  %v1919_v62 = vpop.eup %1918  ;;  %1944 = vpow2.f32 %v772_v20  ;;  %v1451_v15 = vsub.f32 %v2577_v5, %v1383_v7  ;;  %832 = vmatprep.subr.bf16.mxu1 %v787_v32 }
 0x33d   :  { %v1921_v52 = vpop.eup %1920  ;;  %1946 = vpow2.f32 %v766_v46  ;;  %v1572_v47 = vmul.f32 1.442695, %v1452_v42  ;;  %v1574_v16 = vmul.f32 1.442695, %v1453_v45  ;;  %833 = vmatpush1.bf16.xpose.msra.mxu1 %v786_v10  ;;  %v1588_v59 = vpack.c.bf16 %v2818_v1, %v1919_v62 }
 0x33e   :  { %v1568_v31 = vmul.f32 1.442695, %v1450_v12  ;;  %v2840_v4 = vpop.eup %1922  ;;  %1948 = vpow2.f32 %v768_v6  ;;  %v1570_v24 = vmul.f32 1.442695, %v1451_v15  ;;  %v578_v51 = vpop.xlane.xlu0 %577  ;;  %v1589_v63 = vpack.c.bf16 %v1909_v27, %v1921_v52  ;;  %v3248_v52 = vld [vmem:[#allocation122_spill] sm:$0xff] }
 0x33f   :  { %v575_v17 = vpop.xlane.xlu1 %574  ;;  %v2843_v60 = vpop.eup %1924  ;;  %1950 = vpow2.f32 %v1572_v47  ;;  %v646_v5 = vsub.f32 %v2495_v44, %v578_v51  ;;  %v647_v48 = vsub.f32 %v2499_v53, %v578_v51 }
 0x340   :  { %v644_v34 = vsub.f32 %v2483_v14, %v575_v17  ;;  %v1927_v9 = vpop.eup %1926  ;;  %1952 = vpow2.f32 %v1574_v16  ;;  %v645_v0 = vsub.f32 %v2487_v13, %v575_v17  ;;  %1634 = vmatprep.subr.bf16.mxu0 %v1589_v63  ;;  %v3249_v16 = vld [vmem:[#allocation119_spill] sm:$0xff] }
 0x341   :  { %v1929_v55 = vpop.eup %1928  ;;  %1954 = vpow2.f32 %v1568_v31  ;;  %v762_v39 = vmul.f32 1.442695, %v646_v5  ;;  %v764_v35 = vmul.f32 1.442695, %v647_v48  ;;  %1635 = vmatpush1.bf16.xpose.msra.mxu0 %v1588_v59  ;;  %v3250_v59 = vld [vmem:[#allocation120_spill] sm:$0xff] }
 0x342   :  { %v758_v18 = vmul.f32 1.442695, %v644_v34  ;;  %v1931_v1 = vpop.eup %1930  ;;  %1956 = vpow2.f32 %v1570_v24  ;;  %v760_v58 = vmul.f32 1.442695, %v645_v0  ;;  %v1380_v28 = vpop.xlane.xlu0 %1379 }
 0x343   :  { %v1377_v44 = vpop.xlane.xlu1 %1376  ;;  %v1933_v30 = vpop.eup %1932  ;;  %1958 = vpow2.f32 %v762_v39  ;;  %v1448_v14 = vsub.f32 %v2567_v3, %v1380_v28  ;;  %v1449_v53 = vsub.f32 %v2569_v22, %v1380_v28  ;;  %v816_v23 = vpack.c.bf16 %v1931_v1, %v1927_v9  ;;  %v3251_v39 = vld [vmem:[#allocation97_spill] sm:$0xff] }
 0x344   :  { %v1446_v13 = vsub.f32 %v2561_v43, %v1377_v44  ;;  %v1935_v37 = vpop.eup %1934  ;;  %1960 = vpow2.f32 %v764_v35  ;;  %v1447_v8 = vsub.f32 %v2563_v21, %v1377_v44  ;;  %v817_v27 = vpack.c.bf16 %v1933_v30, %v1929_v55 }
 0x345   :  { %v1937_v38 = vpop.eup %1936  ;;  %1962 = vpow2.f32 %v758_v18  ;;  %v1564_v54 = vmul.f32 1.442695, %v1448_v14  ;;  %v1566_v61 = vmul.f32 1.442695, %v1449_v53  ;;  %v3252_v18 = vld [vmem:[#allocation99_spill] sm:$0xff] }
 0x346   :  { %v1560_v57 = vmul.f32 1.442695, %v1446_v13  ;;  %v1939_v25 = vpop.eup %1938  ;;  %1964 = vpow2.f32 %v760_v58  ;;  %v1562_v56 = vmul.f32 1.442695, %v1447_v8  ;;  %834 = vmatprep.subr.bf16.mxu1 %v817_v27  ;;  %v572_v3 = vpop.xlane.xlu0 %571  ;;  %v3253_v58 = vld [vmem:[#allocation93_spill] sm:$0xff] }
 0x347   :  { %v569_v2 = vpop.xlane.xlu1 %568  ;;  %v1941_v22 = vpop.eup %1940  ;;  %1966 = vpow2.f32 %v1564_v54  ;;  %835 = vmatpush2.bf16.xpose.msra.mxu1 %v816_v23  ;;  %v642_v43 = vsub.f32 %v2471_v41, %v572_v3  ;;  %v643_v21 = vsub.f32 %v3246_v40, %v572_v3  ;;  %v1618_v46 = vpack.c.bf16 %v1939_v25, %v1935_v37  ;;  %v3254_v37 = vld [vmem:[#allocation95_spill] sm:$0xff] }
 0x348   :  { %v640_v26 = vsub.f32 %v2459_v50, %v569_v2  ;;  %v1943_v19 = vpop.eup %1942  ;;  %1968 = vpow2.f32 %v1566_v61  ;;  %v641_v29 = vsub.f32 %v2463_v36, %v569_v2  ;;  %v1619_v20 = vpack.c.bf16 %v1941_v22, %v1937_v38  ;;  %v3247_v36 = vld [vmem:[#allocation121_spill] sm:$0xff] }
 0x349   :  { %v1945_v6 = vpop.eup %1944  ;;  %1970 = vpow2.f32 %v1560_v57  ;;  %v754_v49 = vmul.f32 1.442695, %v642_v43  ;;  %v756_v7 = vmul.f32 1.442695, %v643_v21  ;;  %v814_v12 = vpack.c.bf16 %v2826_v33, %v1943_v19  ;;  %v3255_v57 = vld [vmem:[#allocation117_spill] sm:$0xff] }
 0x34a   :  { %v750_v32 = vmul.f32 1.442695, %v640_v26  ;;  %v2857_v10 = vpop.eup %1946  ;;  %1972 = vpow2.f32 %v1562_v56  ;;  %v752_v42 = vmul.f32 1.442695, %v641_v29  ;;  %1636 = vmatprep.subr.bf16.mxu0 %v1619_v20  ;;  %v1374_v41 = vpop.xlane.xlu0 %1373  ;;  %v815_v50 = vpack.c.bf16 %v2834_v11, %v1945_v6  ;;  %v3256_v56 = vld [vmem:[#allocation118_spill] sm:$0xff]  ;;  %v3257_v2 = vld [vmem:[#allocation113_spill] sm:$0xff] }
 0x34b   :  { %v1371_v45 = vpop.xlane.xlu1 %1370  ;;  %v1949_v62 = vpop.eup %1948  ;;  %1974 = vpow2.f32 %v754_v49  ;;  %1637 = vmatpush2.bf16.xpose.msra.mxu0 %v1618_v46  ;;  %v1444_v15 = vsub.f32 %v3247_v36, %v1374_v41  ;;  %v1445_v47 = vsub.f32 %v3248_v52, %v1374_v41  ;;  %v3258_v20 = vld [vmem:[#allocation115_spill] sm:$0xff] }
 0x34c   :  { %v1442_v31 = vsub.f32 %v3249_v16, %v1371_v45  ;;  %v1951_v24 = vpop.eup %1950  ;;  %1976 = vpow2.f32 %v756_v7  ;;  %836 = vmatprep.subr.bf16.mxu1 %v815_v50  ;;  %v1443_v11 = vsub.f32 %v3250_v59, %v1371_v45  ;;  %v3260_v45 = vld [vmem:[#allocation91_spill] sm:$0xff] }
 0x34d   :  { %v1953_v51 = vpop.eup %1952  ;;  %1978 = vpow2.f32 %v750_v32  ;;  %v1556_v17 = vmul.f32 1.442695, %v1444_v15  ;;  %v1558_v63 = vmul.f32 1.442695, %v1445_v47  ;;  %v1616_v0 = vpack.c.bf16 %v2840_v4, %v1951_v24  ;;  %v3261_v47 = vld [vmem:[#allocation85_spill] sm:$0xff] }
 0x34e   :  { %v2865_v5 = vpop.eup %1954  ;;  %1980 = vpow2.f32 %v752_v42  ;;  %v1552_v33 = vmul.f32 1.442695, %v1442_v31  ;;  %v566_v48 = vpop.xlane.xlu0 %565  ;;  %v1617_v9 = vpack.c.bf16 %v2843_v60, %v1953_v51  ;;  %v1554_v14 = vmul.f32 1.442695, %v1443_v11  ;;  %v3259_v42 = vld [vmem:[#allocation89_spill] sm:$0xff]  ;;  %v3262_v51 = vld [vmem:[#allocation87_spill] sm:$0xff] }
 0x34f   :  { %v563_v34 = vpop.xlane.xlu1 %562  ;;  %v1957_v55 = vpop.eup %1956  ;;  %1982 = vpow2.f32 %v1556_v17  ;;  %837 = vmatpush2.bf16.xpose.msra.mxu1 %v814_v12  ;;  %v638_v35 = vsub.f32 %v3251_v39, %v566_v48  ;;  %v639_v1 = vsub.f32 %v3252_v18, %v566_v48 }
 0x350   :  { %v636_v28 = vsub.f32 %v3253_v58, %v563_v34  ;;  %v1959_v44 = vpop.eup %1958  ;;  %1984 = vpow2.f32 %v1558_v63  ;;  %1638 = vmatprep.subr.bf16.mxu0 %v1617_v9  ;;  %v637_v60 = vsub.f32 %v3254_v37, %v563_v34  ;;  %v3264_v34 = vld [vmem:[#allocation112_spill] sm:$0xff]  ;;  %v3265_v58 = vld [vmem:[#allocation109_spill] sm:$0xff] }
 0x351   :  { %v1961_v30 = vpop.eup %1960  ;;  %v746_v53 = vmul.f32 1.442695, %v638_v35  ;;  %v748_v13 = vmul.f32 1.442695, %v639_v1  ;;  %1986 = vpow2.f32 %v1552_v33  ;;  %v812_v54 = vpack.c.bf16 %v2857_v10, %v1959_v44 }
 0x352   :  { %v2873_v8 = vpop.eup %1962  ;;  %v742_v4 = vmul.f32 1.442695, %v636_v28  ;;  %v1368_v27 = vpop.xlane.xlu0 %1367  ;;  %v813_v38 = vpack.c.bf16 %v1949_v62, %v1961_v30  ;;  %v744_v21 = vmul.f32 1.442695, %v637_v60  ;;  %v3266_v30 = vld [vmem:[#allocation110_spill] sm:$0xff] }
 0x353   :  { %v1365_v23 = vpop.xlane.xlu1 %1364  ;;  %v1965_v61 = vpop.eup %1964  ;;  %1988 = vpow2.f32 %v746_v53  ;;  %1639 = vmatpush2.bf16.xpose.msra.mxu0 %v1616_v0  ;;  %v1440_v25 = vsub.f32 %v3255_v57, %v1368_v27  ;;  %v1441_v3 = vsub.f32 %v3256_v56, %v1368_v27  ;;  %v3268_v27 = vld [vmem:[#allocation83_spill] sm:$0xff] }
 0x354   :  { %v1438_v22 = vsub.f32 %v3257_v2, %v1365_v23  ;;  %v1967_v43 = vpop.eup %1966  ;;  %1990 = vpow2.f32 %v748_v13  ;;  %838 = vmatprep.subr.bf16.mxu1 %v813_v38  ;;  %v1439_v46 = vsub.f32 %v3258_v20, %v1365_v23  ;;  %v3271_v20 = vld [vmem:[#allocation108_spill] sm:$0xff] }
 0x355   :  { %v1969_v40 = vpop.eup %1968  ;;  %1992 = vpow2.f32 %v1554_v14  ;;  %v1548_v26 = vmul.f32 1.442695, %v1440_v25  ;;  %v1550_v19 = vmul.f32 1.442695, %v1441_v3  ;;  %v1614_v12 = vpack.c.bf16 %v2865_v5, %v1967_v43  ;;  %v3263_v5 = vld [vmem:[#allocation111_spill] sm:$0xff] }
 0x356   :  { %v2879_v29 = vpop.eup %1970  ;;  %1994 = vpow2.f32 %v742_v4  ;;  %v1544_v6 = vmul.f32 1.442695, %v1438_v22  ;;  %v560_v49 = vpop.xlane.xlu0 %559  ;;  %v1615_v32 = vpack.c.bf16 %v1957_v55, %v1969_v40  ;;  %v1546_v24 = vmul.f32 1.442695, %v1439_v46  ;;  %v3269_v22 = vld [vmem:[#allocation79_spill] sm:$0xff] }
 0x357   :  { %v557_v7 = vpop.xlane.xlu1 %556  ;;  %v1973_v10 = vpop.eup %1972  ;;  %1996 = vpow2.f32 %v1548_v26  ;;  %839 = vmatpush2.bf16.xpose.msra.mxu1 %v812_v54  ;;  %v634_v41 = vsub.f32 %v3259_v42, %v560_v49  ;;  %v635_v50 = vsub.f32 %v3260_v45, %v560_v49 }
 0x358   :  { %v1975_v62 = vpop.eup %1974  ;;  %1998 = vpow2.f32 %v1550_v19  ;;  %1640 = vmatprep.subr.bf16.mxu0 %v1615_v32  ;;  %v632_v16 = vsub.f32 %v3261_v47, %v557_v7  ;;  %v633_v17 = vsub.f32 %v3262_v51, %v557_v7  ;;  %v3270_v19 = vld [vmem:[#allocation107_spill] sm:$0xff] }
 0x359   :  { %v1977_v36 = vpop.eup %1976  ;;  %2000 = vpow2.f32 %v744_v21  ;;  %v738_v15 = vmul.f32 1.442695, %v634_v41  ;;  %v740_v52 = vmul.f32 1.442695, %v635_v50  ;;  %v810_v0 = vpack.c.bf16 %v2873_v8, %v1975_v62  ;;  %v3267_v8 = vld [vmem:[#allocation81_spill] sm:$0xff]  ;;  %v3273_v62 = vld [vmem:[#allocation106_spill] sm:$0xff] }
 0x35a   :  { %v2886_v31 = vpop.eup %1978  ;;  %2002 = vpow2.f32 %v1544_v6  ;;  %v1362_v63 = vpop.xlane.xlu0 %1361  ;;  %v811_v11 = vpack.c.bf16 %v1965_v61, %v1977_v36  ;;  %v734_v35 = vmul.f32 1.442695, %v632_v16  ;;  %v736_v44 = vmul.f32 1.442695, %v633_v17  ;;  %v3274_v16 = vld [vmem:[#allocation73_spill] sm:$0xff] }
 0x35b   :  { %v1359_v59 = vpop.xlane.xlu1 %1358  ;;  %v1981_v33 = vpop.eup %1980  ;;  %2004 = vpow2.f32 %v738_v15  ;;  %1641 = vmatpush2.bf16.xpose.msra.mxu0 %v1614_v12  ;;  %v1436_v48 = vsub.f32 %v3263_v5, %v1362_v63  ;;  %v1437_v9 = vsub.f32 %v3264_v34, %v1362_v63 }
 0x35c   :  { %v1983_v55 = vpop.eup %1982  ;;  %2006 = vpow2.f32 %v740_v52  ;;  %840 = vmatprep.subr.bf16.mxu1 %v811_v11  ;;  %v1434_v28 = vsub.f32 %v3265_v58, %v1359_v59  ;;  %v1435_v14 = vsub.f32 %v3266_v30, %v1359_v59 }
 0x35d   :  { %v1985_v39 = vpop.eup %1984  ;;  %v1540_v18 = vmul.f32 1.442695, %v1436_v48  ;;  %v1542_v1 = vmul.f32 1.442695, %v1437_v9  ;;  %2008 = vpow2.f32 %v1546_v24  ;;  %v1612_v38 = vpack.c.bf16 %v2879_v29, %v1983_v55  ;;  %v3275_v24 = vld [vmem:[#allocation75_spill] sm:$0xff] }
 0x35e   :  { %v554_v53 = vpop.xlane.xlu0 %553  ;;  %v1613_v37 = vpack.c.bf16 %v1973_v10, %v1985_v39  ;;  %v1987_v60 = vpop.eup %1986  ;;  %v1536_v57 = vmul.f32 1.442695, %v1434_v28  ;;  %v1538_v2 = vmul.f32 1.442695, %v1435_v14  ;;  %v3272_v10 = vld [vmem:[#allocation77_spill] sm:$0xff] }
 0x35f   :  { %v551_v13 = vpop.xlane.xlu1 %550  ;;  %2010 = vpow2.f32 %v1540_v18  ;;  %841 = vmatpush2.bf16.xpose.msra.mxu1 %v810_v0  ;;  %v630_v4 = vsub.f32 %v3267_v8, %v554_v53  ;;  %v631_v23 = vsub.f32 %v3268_v27, %v554_v53 }
 0x360   :  { %v1989_v54 = vpop.eup %1988  ;;  %2012 = vpow2.f32 %v1542_v1  ;;  %1642 = vmatprep.subr.bf16.mxu0 %v1613_v37  ;;  %v629_v43 = vsub.f32 %v3269_v22, %v551_v13  ;;  %v628_v42 = vsub.f32 %v3272_v10, %v551_v13  ;;  %v3278_v1 = vld [vmem:[#allocation103_spill] sm:$0xff] }
 0x361   :  { %v1991_v61 = vpop.eup %1990  ;;  %2014 = vpow2.f32 %v734_v35  ;;  %v730_v25 = vmul.f32 1.442695, %v630_v4  ;;  %v732_v56 = vmul.f32 1.442695, %v631_v23  ;;  %v808_v49 = vpack.c.bf16 %v2886_v31, %v1989_v54  ;;  %v3277_v35 = vld [vmem:[#allocation102_spill] sm:$0xff] }
 0x362   :  { %v1993_v3 = vpop.eup %1992  ;;  %2016 = vpow2.f32 %v736_v44  ;;  %v1356_v40 = vpop.xlane.xlu0 %1355  ;;  %v809_v21 = vpack.c.bf16 %v1981_v33, %v1991_v61  ;;  %v728_v12 = vmul.f32 1.442695, %v629_v43  ;;  %v726_v11 = vmul.f32 1.442695, %v628_v42  ;;  %v3276_v33 = vld [vmem:[#allocation105_spill] sm:$0xff]  ;;  %v3279_v61 = vld [vmem:[#allocation11_spill] sm:$0xff] }
 0x363   :  { %v1995_v26 = vpop.eup %1994  ;;  %2018 = vpow2.f32 %v730_v25  ;;  %1643 = vmatpush2.bf16.xpose.msra.mxu0 %v1612_v38  ;;  %v1432_v29 = vsub.f32 %v3270_v19, %v1356_v40  ;;  %v1433_v46 = vsub.f32 %v3271_v20, %v1356_v40  ;;  %v1353_v6 = vpop.xlane.xlu1 %1352  ;;  %v3280_v25 = vld [vmem:[#allocation21_spill] sm:$0xff] }
 0x364   :  { %v1997_v7 = vpop.eup %1996  ;;  %2020 = vpow2.f32 %v732_v56  ;;  %842 = vmatprep.subr.bf16.mxu1 %v809_v21  ;;  %v1431_v36 = vsub.f32 %v3273_v62, %v1353_v6  ;;  %v1430_v5 = vsub.f32 %v3276_v33, %v1353_v6  ;;  %v3281_v43 = vld [vmem:[#allocation9_spill] sm:$0xff]  ;;  %v3282_v21 = vld [vmem:[#allocation19_spill] sm:$0xff]  ;;  %v3285_v33 = vld [vmem:[#allocation10_spill] sm:$0xff] }
 0x365   :  { %v1999_v32 = vpop.eup %1998  ;;  %2022 = vpow2.f32 %v1536_v57  ;;  %v1532_v41 = vmul.f32 1.442695, %v1432_v29  ;;  %v1534_v45 = vmul.f32 1.442695, %v1433_v46  ;;  %v1610_v17 = vpack.c.bf16 %v1987_v60, %v1997_v7 }
 0x366   :  { %v2001_v50 = vpop.eup %2000  ;;  %2024 = vpow2.f32 %v1538_v2  ;;  %v548_v15 = vpop.xlane.xlu0 %547  ;;  %v1611_v52 = vpack.c.bf16 %v1993_v3, %v1999_v32  ;;  %v1530_v9 = vmul.f32 1.442695, %v1431_v36  ;;  %v1528_v14 = vmul.f32 1.442695, %v1430_v5 }
 0x367   :  { %v2003_v47 = vpop.eup %2002  ;;  %2026 = vpow2.f32 %v1532_v41  ;;  %843 = vmatpush2.bf16.xpose.msra.mxu1 %v808_v49  ;;  %v626_v31 = vsub.f32 %v3274_v16, %v548_v15  ;;  %v627_v51 = vsub.f32 %v3275_v24, %v548_v15  ;;  %v2908_v60 = vpop.permute.xlu1 %73  ;;  %v3283_v24 = vld [vmem:[#allocation8_spill] sm:$0xff] }
 0x368   :  { %v2005_v63 = vpop.eup %2004  ;;  %2028 = vpow2.f32 %v1534_v45  ;;  %1644 = vmatprep.subr.bf16.mxu0 %v1611_v52  ;;  %v173_v57 = vadd.f32 %v3279_v61, %v2908_v60  ;;  %v977_v56 = vadd.f32 %v3280_v25, %v2908_v60  ;;  %v171_v5 = vadd.f32 %v3285_v33, %v2908_v60 }
 0x369   :  { %v2007_v59 = vpop.eup %2006  ;;  %v722_v48 = vmul.f32 1.442695, %v626_v31  ;;  %v724_v34 = vmul.f32 1.442695, %v627_v51  ;;  %2030 = vpow2.f32 %v728_v12  ;;  %v806_v28 = vpack.c.bf16 %v1995_v26, %v2005_v63  ;;  %v3284_v63 = vld [vmem:[#allocation15_spill] sm:$0xff] }
 0x36a   :  { %v1350_v0 = vpop.xlane.xlu0 %1349  ;;  %v807_v55 = vpack.c.bf16 %v2001_v50, %v2007_v59  ;;  %v2009_v39 = vpop.eup %2008  ;;  %v200_v7 = vmax.f32 %v173_v57, 0.0  ;;  %v1004_v10 = vmax.f32 %v977_v56, 0.0  ;;  %v3293_v56 = vld [vmem:[#allocation12_spill] sm:$0xff] }
 0x36b   :  { %2032 = vpow2.f32 %v722_v48  ;;  %1645 = vmatpush2.bf16.xpose.msra.mxu0 %v1610_v17  ;;  %v1428_v18 = vsub.f32 %v3277_v35, %v1350_v0  ;;  %v1429_v58 = vsub.f32 %v3278_v1, %v1350_v0  ;;  %v2916_v20 = vpop.permute.xlu1 %78  ;;  %v3288_v1 = vld [vmem:[#allocation25_spill] sm:$0xff] }
 0x36c   :  { %v2011_v44 = vpop.eup %2010  ;;  %2034 = vpow2.f32 %v724_v34  ;;  %844 = vmatprep.subr.bf16.mxu1 %v807_v55  ;;  %v3286_v34 = vld [vmem:[#allocation13_spill] sm:$0xff] }
 0x36d   :  { %v2013_v30 = vpop.eup %2012  ;;  %2036 = vpow2.f32 %v726_v11  ;;  %v1524_v53 = vmul.f32 1.442695, %v1428_v18  ;;  %v1526_v13 = vmul.f32 1.442695, %v1429_v58  ;;  %v1608_v27 = vpack.c.bf16 %v2003_v47, %v2011_v44  ;;  %v3289_v44 = vld [vmem:[#allocation20_spill] sm:$0xff] }
 0x36e   :  { %v2015_v37 = vpop.eup %2014  ;;  %2038 = vpow2.f32 %v1530_v9  ;;  %v1609_v8 = vpack.c.bf16 %v2009_v39, %v2013_v30  ;;  %v179_v9 = vadd.f32 %v3286_v34, %v2916_v20  ;;  %v3287_v39 = vld [vmem:[#allocation18_spill] sm:$0xff]  ;;  %v975_v30 = vadd.f32 %v3289_v44, %v2908_v60 }
 0x36f   :  { %v2017_v4 = vpop.eup %2016  ;;  %2040 = vpow2.f32 %v1524_v53  ;;  %845 = vmatpush2.bf16.xpose.msra.mxu1 %v806_v28  ;;  %v84_v15 = vpop.permute.xlu1 %83  ;;  %v199_v28 = vmax.f32 %v171_v5, 0.0  ;;  %v3290_v53 = vld [vmem:[#allocation23_spill] sm:$0xff] }
 0x370   :  { %v2019_v23 = vpop.eup %2018  ;;  %2042 = vpow2.f32 %v1526_v13  ;;  %1646 = vmatprep.subr.bf16.mxu0 %v1609_v8  ;;  %v183_v59 = vadd.f32 %v3284_v63, %v84_v15  ;;  %v987_v58 = vadd.f32 %v3288_v1, %v84_v15  ;;  %v983_v13 = vadd.f32 %v3290_v53, %v2916_v20  ;;  %v3291_v8 = vld [vmem:[#allocation14_spill] sm:$0xff] }
 0x371   :  { %v2021_v38 = vpop.eup %2020  ;;  %2044 = vpow2.f32 %v1528_v14  ;;  %v804_v19 = vpack.c.bf16 %v2015_v37, %v2019_v23  ;;  %v202_v37 = vmax.f32 %v179_v9, 0.0  ;;  %v1003_v25 = vmax.f32 %v975_v30, 0.0 }
 0x372   :  { %v2023_v54 = vpop.eup %2022  ;;  %v69_v3 = vpop.permute.xlu0 %68  ;;  %v805_v2 = vpack.c.bf16 %v2017_v4, %v2021_v38  ;;  %v204_v18 = vmax.f32 %v183_v59, 0.0  ;;  %v181_v4 = vadd.f32 %v3291_v8, %v84_v15  ;;  %v1008_v38 = vmax.f32 %v987_v58, 0.0 }
 0x373   :  { %v2025_v22 = vpop.eup %2024  ;;  %1647 = vmatpush2.bf16.xpose.msra.mxu0 %v1608_v27  ;;  %v169_v40 = vadd.f32 %v3281_v43, %v69_v3  ;;  %v973_v26 = vadd.f32 %v3282_v21, %v69_v3  ;;  %v167_v51 = vadd.f32 %v3283_v24, %v69_v3  ;;  %v971_v35 = vadd.f32 %v3287_v39, %v69_v3 }
 0x374   :  { %v2027_v29 = vpop.eup %2026  ;;  %846 = vmatprep.subr.bf16.mxu1 %v805_v2  ;;  %v214_v57 = vpack.c.bf16 %v204_v18, %v202_v37  ;;  %v177_v3 = vadd.f32 %v3293_v56, %v2916_v20  ;;  %v1006_v60 = vmax.f32 %v983_v13, 0.0  ;;  %v203_v2 = vmax.f32 %v181_v4, 0.0 }
 0x375   :  { %v2029_v46 = vpop.eup %2028  ;;  %v198_v6 = vmax.f32 %v169_v40, 0.0  ;;  %v1002_v32 = vmax.f32 %v973_v26, 0.0  ;;  %v1606_v41 = vpack.c.bf16 %v2023_v54, %v2027_v29  ;;  %v197_v55 = vmax.f32 %v167_v51, 0.0  ;;  %v3292_v54 = vld [vmem:[#allocation17_spill] sm:$0xff]  ;;  %v3295_v26 = vld [vmem:[#allocation27_spill] sm:$0xff] }
 0x376   :  { %v1607_v49 = vpack.c.bf16 %v2025_v22, %v2029_v46  ;;  %v2031_v42 = vpop.eup %2030  ;;  %v89_v14 = vpop.permute.xlu0 %88  ;;  %v1001_v23 = vmax.f32 %v971_v35, 0.0  ;;  %v3294_v22 = vld [vmem:[#allocation24_spill] sm:$0xff]  ;;  %v1018_v29 = vpack.c.bf16 %v1008_v38, %v1006_v60  ;;  %v3296_v46 = vld [vmem:[#allocation22_spill] sm:$0xff]  ;;  %v881_v58 = vlaneseq }
 0x377   :  { %847 = vmatpush2.bf16.xpose.msra.mxu1 %v804_v19  ;;  %v212_v50 = vpack.c.bf16 %v200_v7, %v198_v6  ;;  %v1016_v12 = vpack.c.bf16 %v1004_v10, %v1002_v32  ;;  %v211_v27 = vpack.c.bf16 %v199_v28, %v197_v55  ;;  %v189_v61 = vadd.f32 %v3292_v54, %v89_v14  ;;  %v3297_v32 = vld [vmem:[#allocation16_spill] sm:$0xff] }
 0x378   :  { %v2033_v45 = vpop.eup %2032  ;;  %1648 = vmatprep.subr.bf16.mxu0 %v1607_v49  ;;  %v985_v43 = vadd.f32 %v3294_v22, %v84_v15  ;;  %v1015_v40 = vpack.c.bf16 %v1003_v25, %v1001_v23  ;;  %v993_v19 = vadd.f32 %v3295_v26, %v89_v14  ;;  %v981_v6 = vadd.f32 %v3296_v46, %v2916_v20 }
 0x379   :  { %v2035_v62 = vpop.eup %2034  ;;  %850 = vmatprep.mubr.bf16.mxu1 %v212_v50  ;;  %1652 = vmatprep.mubr.bf16.mxu0 %v1016_v12  ;;  %v206_v21 = vmax.f32 %v189_v61, 0.0  ;;  %v201_v49 = vmax.f32 %v177_v3, 0.0  ;;  %v187_v10 = vadd.f32 %v3297_v32, %v89_v14  ;;  %v882_v53 = vshrl.u32 %v881_v58, 7  ;;  %v2054_v3 = vld [vmem:[#allocation2] sm:$0xff] }
 0x37a   :  { %v2037_v36 = vpop.eup %2036  ;;  %v803_v52 = vpack.c.bf16 %v2031_v42, %v2035_v62  ;;  %v1007_v7 = vmax.f32 %v985_v43, 0.0  ;;  %v1005_v50 = vmax.f32 %v981_v6, 0.0  ;;  %v3298_v62 = vld [vmem:[#allocation26_spill] sm:$0xff]  ;;  %v2056_v43 = vld [vmem:[#allocation2 + $0x20] sm:$0xff] }
 0x37b   :  { %v2039_v47 = vpop.eup %2038  ;;  %1649 = vmatpush2.bf16.xpose.msra.mxu0 %v1606_v41  ;;  %v802_v16 = vpack.c.bf16 %v2037_v36, %v2033_v45  ;;  %v213_v42 = vpack.c.bf16 %v203_v2, %v201_v49  ;;  %v1010_v41 = vmax.f32 %v993_v19, 0.0  ;;  %v216_v45 = vpack.c.bf16 %v206_v21, %v206_v21  ;;  %v2055_v2 = vld [vmem:[#allocation2 + $0x10] sm:$0xff] }
 0x37c   :  { %v2041_v31 = vpop.eup %2040  ;;  %848 = vmatprep.subr.bf16.mxu1 %v803_v52  ;;  %v205_v12 = vmax.f32 %v187_v10, 0.0  ;;  %v991_v36 = vadd.f32 %v3298_v62, %v89_v14  ;;  %v1017_v15 = vpack.c.bf16 %v1007_v7, %v1005_v50  ;;  %v883_v8 = vsub.s32 0, %v882_v53  ;;  %v2057_v21 = vld [vmem:[#allocation2 + $0x30] sm:$0xff]  ;;  %v2058_v10 = vld [vmem:[#allocation2 + $0x8] sm:$0xff]  ;;  %v2061_v62 = vld [vmem:[#allocation2 + $0x38] sm:$0xff] }
 0x37d   :  { %v2043_v17 = vpop.eup %2042  ;;  %v1020_v52 = vpack.c.bf16 %v1010_v41, %v1010_v41  ;;  %v2059_v41 = vld [vmem:[#allocation2 + $0x18] sm:$0xff]  ;;  %v2060_v50 = vld [vmem:[#allocation2 + $0x28] sm:$0xff] }
 0x37e   :  { %v2045_v11 = vpop.eup %2044  ;;  %v1605_v48 = vpack.c.bf16 %v2039_v47, %v2043_v17  ;;  %v1009_v20 = vmax.f32 %v991_v36, 0.0  ;;  %v215_v47 = vpack.c.bf16 %v205_v12, %v205_v12 }
 0x37f   :  { %849 = vmatpush2.bf16.xpose.msra.mxu1 %v802_v16  ;;  %v1604_v0 = vpack.c.bf16 %v2045_v11, %v2041_v31 }
 0x380   :  { %1650 = vmatprep.subr.bf16.mxu0 %v1605_v48  ;;  %v1019_v16 = vpack.c.bf16 %v1009_v20, %v1009_v20 }
 0x383   :  { %1651 = vmatpush2.bf16.xpose.msra.mxu0 %v1604_v0 }
 0x386   :  { %851 = vmatmul.mubr.bf16.vlgmr.msra.gmra.mxu1 %v211_v27 }
 0x387   :  { %860 = vmatprep.mubr.bf16.mxu1 %v214_v57 }
 0x38a   :  { %1653 = vmatmul.mubr.bf16.vlgmr.msra.gmra.mxu0 %v1015_v40 }
 0x38b   :  { %1662 = vmatprep.mubr.bf16.mxu0 %v1018_v29 }
 0x38e   :  { %861 = vmatmul.mubr.bf16.gmra.mxu1 %v213_v42 }
 0x38f   :  { %870 = vmatprep.mubr.bf16.mxu1 %v216_v45 }
 0x392   :  { %1663 = vmatmul.mubr.bf16.gmra.mxu0 %v1017_v15 }
 0x393   :  { %1672 = vmatprep.mubr.bf16.mxu0 %v1020_v52 }
 0x396   :  { %871 = vmatmul.mubr.bf16.gmra.mxu1 %v215_v47 }
 0x39a   :  { %1673 = vmatmul.mubr.bf16.gmra.mxu0 %v1019_v16 }
 0x446   :  { %v852_v31 = vpop.f32.mrf.mxu1 }
 0x448   :  { %v854_v24 = vpop.f32.mrf.mxu1 }
 0x44a   :  { %v856_v51 = vpop.f32.mrf.mxu1  ;;  %v2940_v17 = vpop.f32.mrf.mxu0 }
 0x44c   :  { %v858_v63 = vpop.f32.mrf.mxu1  ;;  %v2942_v59 = vpop.f32.mrf.mxu0 }
 0x44e   :  { %v862_v11 = vpop.f32.mrf.mxu1  ;;  %v1658_v33 = vpop.f32.mrf.mxu0 }
 0x450   :  { %v864_v5 = vpop.f32.mrf.mxu1  ;;  %v2944_v48 = vpop.f32.mrf.mxu0 }
 0x452   :  { %v866_v34 = vpop.f32.mrf.mxu1  ;;  %v1664_v9 = vpop.f32.mrf.mxu0 }
 0x454   :  { %v868_v0 = vpop.f32.mrf.mxu1  ;;  %v2946_v55 = vpop.f32.mrf.mxu0 }
 0x456   :  { %v872_v39 = vpop.f32.mrf.mxu1  ;;  %v1668_v35 = vpop.f32.mrf.mxu0 }
 0x457   :  { %2046 = vrcp.f32 %v872_v39  ;;  %v2066_v39 = vld [vmem:[#allocation2 + $0x48] sm:$0xff] }
 0x458   :  { %v874_v18 = vpop.f32.mrf.mxu1  ;;  %v1670_v1 = vpop.f32.mrf.mxu0 }
 0x459   :  { %2048 = vrcp.f32 %v874_v18  ;;  %v2067_v18 = vld [vmem:[#allocation2 + $0x58] sm:$0xff] }
 0x45a   :  { %v876_v28 = vpop.f32.mrf.mxu1  ;;  %v1674_v44 = vpop.f32.mrf.mxu0 }
 0x45b   :  { %2050 = vrcp.f32 %v1674_v44  ;;  %v2068_v28 = vld [vmem:[#allocation2 + $0x68] sm:$0xff] }
 0x45c   :  { %v877_v30 = vpop.f32.mrf.mxu1  ;;  %v1676_v14 = vpop.f32.mrf.mxu0 }
 0x45d   :  { %2052 = vrcp.f32 %v1676_v14 }
 0x45e   :  { %v1678_v13 = vpop.f32.mrf.mxu0 }
 0x460   :  { %v1679_v37 = vpop.f32.mrf.mxu0 }
 0x464   :  { %v2047_v4 = vpop.eup %2046 }
 0x465   :  { %v884_v27 = vrot.slane %v2047_v4, %v883_v8 }
 0x466   :  { %v2049_v23 = vpop.eup %2048 }
 0x467   :  { %v889_v38 = vmul.f32 %v884_v27, %v852_v31  ;;  %v891_v54 = vmul.f32 %v884_v27, %v856_v51  ;;  %v893_v61 = vmul.f32 %v884_v27, %v862_v11  ;;  %v895_v57 = vmul.f32 %v884_v27, %v866_v34 }
 0x468   :  { %v2051_v25 = vpop.eup %2050  ;;  %v888_v56 = vrot.slane %v2049_v23, %v883_v8 }
 0x469   :  { %v897_v60 = vmul.f32 %v2054_v3, %v889_v38  ;;  %v899_v22 = vmul.f32 %v2055_v2, %v891_v54  ;;  %v901_v40 = vmul.f32 %v2056_v43, %v893_v61  ;;  %v903_v26 = vmul.f32 %v2057_v21, %v895_v57 }
 0x46a   :  { %v2053_v19 = vpop.eup %2052  ;;  %v890_v29 = vmul.f32 %v888_v56, %v854_v24  ;;  %v892_v46 = vmul.f32 %v888_v56, %v858_v63  ;;  %v894_v6 = vmul.f32 %v888_v56, %v864_v5  ;;  %v896_v49 = vmul.f32 %v888_v56, %v868_v0  ;;  %v2062_v63 = vld [vmem:[#allocation2 + $0x40] sm:$0xff]  ;;  %v2063_v5 = vld [vmem:[#allocation2 + $0x50] sm:$0xff] }
 0x46b   :  { %905 = vst [vmem:[#allocation5] sm:$0xff] %v897_v60  ;;  %907 = vst [vmem:[#allocation5 + $0x10] sm:$0xff] %v899_v22  ;;  %v1686_v7 = vrot.slane %v2051_v25, %v883_v8  ;;  %v1690_v32 = vrot.slane %v2053_v19, %v883_v8 }
 0x46c   :  { %909 = vst [vmem:[#allocation5 + $0x20] sm:$0xff] %v901_v40  ;;  %911 = vst [vmem:[#allocation5 + $0x30] sm:$0xff] %v903_v26  ;;  %v898_v42 = vmul.f32 %v2058_v10, %v890_v29  ;;  %v900_v45 = vmul.f32 %v2059_v41, %v892_v46  ;;  %v902_v12 = vmul.f32 %v2060_v50, %v894_v6 }
 0x46d   :  { %v904_v36 = vmul.f32 %v2061_v62, %v896_v49  ;;  %v1691_v15 = vmul.f32 %v1686_v7, %v2940_v17  ;;  %v1693_v52 = vmul.f32 %v1686_v7, %v1658_v33  ;;  %v1695_v20 = vmul.f32 %v1686_v7, %v1664_v9  ;;  %v2064_v33 = vld [vmem:[#allocation2 + $0x60] sm:$0xff]  ;;  %v2065_v9 = vld [vmem:[#allocation2 + $0x70] sm:$0xff] }
 0x46e   :  { %v1697_v47 = vmul.f32 %v1686_v7, %v1668_v35  ;;  %906 = vst [vmem:[#allocation5 + $0x8] sm:$0xff] %v898_v42  ;;  %908 = vst [vmem:[#allocation5 + $0x18] sm:$0xff] %v900_v45  ;;  %v1692_v16 = vmul.f32 %v1690_v32, %v2942_v59  ;;  %v1694_v31 = vmul.f32 %v1690_v32, %v2944_v48  ;;  %v2069_v59 = vld [vmem:[#allocation2 + $0x78] sm:$0xff] }
 0x46f   :  { %910 = vst [vmem:[#allocation5 + $0x28] sm:$0xff] %v902_v12  ;;  %912 = vst [vmem:[#allocation5 + $0x38] sm:$0xff] %v904_v36  ;;  %v1696_v24 = vmul.f32 %v1690_v32, %v2946_v55  ;;  %v1698_v51 = vmul.f32 %v1690_v32, %v1670_v1  ;;  %v1699_v11 = vmul.f32 %v2062_v63, %v1691_v15 }
 0x470   :  { %v1701_v17 = vmul.f32 %v2063_v5, %v1693_v52  ;;  %v1703_v34 = vmul.f32 %v2064_v33, %v1695_v20  ;;  %v1705_v0 = vmul.f32 %v2065_v9, %v1697_v47  ;;  %v1700_v35 = vmul.f32 %v2066_v39, %v1692_v16 }
 0x471   :  { %v1702_v58 = vmul.f32 %v2067_v18, %v1694_v31  ;;  %v1704_v44 = vmul.f32 %v2068_v28, %v1696_v24  ;;  %v1706_v30 = vmul.f32 %v2069_v59, %v1698_v51  ;;  %1708 = vst [vmem:[#allocation5 + $0x40] sm:$0xff] %v1699_v11 }
 0x472   :  { %1710 = vst [vmem:[#allocation5 + $0x50] sm:$0xff] %v1701_v17  ;;  %1712 = vst [vmem:[#allocation5 + $0x60] sm:$0xff] %v1703_v34 }
 0x473   :  { %1714 = vst [vmem:[#allocation5 + $0x70] sm:$0xff] %v1705_v0  ;;  %1709 = vst [vmem:[#allocation5 + $0x48] sm:$0xff] %v1700_v35 }
 0x474   :  { %1711 = vst [vmem:[#allocation5 + $0x58] sm:$0xff] %v1702_v58  ;;  %1713 = vst [vmem:[#allocation5 + $0x68] sm:$0xff] %v1704_v44 }
 0x475   :  { %1715 = vst [vmem:[#allocation5 + $0x78] sm:$0xff] %v1706_v30 }
 0x476   :  { %2101 = shalt.err (!%p2098_p9)
}
 0x477   :  { %1727 = dma.vmem_to_hbm [thread:$0]  %s1722_s12, 2048, %s2961_s3, [#allocation4], %s2115_s15, %s2115_s15, %s2116_s16  }
 0x478   :  { %2112 = dma.done.wait [#allocation4], 2048  }
 0x479   :  { %2113 = vsyncadd [#allocation4], 4294965248 }
 0x47a   :  { %1731 = vsyncpa [#allocation3], 1 }
 0x47b   :  { %1732 = vsyncpa [#allocation4], 1 }

</bundles_post_ra>
